<compile_context>
chip_gen: v5e
topology: v5e:2x2
jax: 0.10.0
libtpu: 0.0.40
codegen_flags: <defaults>
</compile_context>

<pallas_src>
import jax
import jax.numpy as jnp
from jax.experimental import pallas as pl
from jax.experimental.pallas import tpu as pltpu

EPS = 1e-5                                 # nn.BatchNorm2d default eps
_VMEM_BLOCK_BUDGET = 12 * 1024 * 1024      # bytes of double-buffered block windows / step
_VMEM_LIMIT = 32 * 1024 * 1024


def _stats_kernel(p_ref, w_ref, stats_ref):
    """Pass 1: conv matmul per tile -> per-channel partial sum / sum of squares."""
    w = w_ref[...]                                     # (K, C) bf16, resident in VMEM
    c = w.shape[1]
    s1 = jnp.zeros((1, c), jnp.float32)
    s2 = jnp.zeros((1, c), jnp.float32)
    for p in range(4):                                 # 4 sublane-aligned pool slabs
        y = jnp.dot(p_ref[p], w, preferred_element_type=jnp.float32)   # (tm, C) f32
        s1 = s1 + jnp.sum(y, axis=0, keepdims=True)
        s2 = s2 + jnp.sum(y * y, axis=0, keepdims=True)
    stats_ref[0] = jnp.concatenate([s1, s2], axis=0)   # (2, C)


def _apply_kernel(p_ref, w_ref, scale_ref, shift_ref, out_ref):
    """Pass 2: recompute conv, fused BN scale/shift, ReLU, 2x2 max-pool, NCHW store."""
    w = w_ref[...]                                     # (K, C) bf16, resident
    scale = scale_ref[...]                             # (1, C) f32
    shift = shift_ref[...]                             # (1, C) f32
    acc = None
    for p in range(4):
        y = jnp.dot(p_ref[p], w, preferred_element_type=jnp.float32)   # (tm, C) f32
        z = jnp.maximum(y * scale + shift, 0.0)        # BN + ReLU
        acc = z if acc is None else jnp.maximum(acc, z)  # 2x2 max-pool over slabs
    k_img, _, hw = out_ref.shape                       # (k images, C, Ho*Wo)
    for i in range(k_img):                             # lane-dense NCHW writeback
        out_ref[i, :, :] = acc[i * hw:(i + 1) * hw, :].T


def _pick_images_per_tile(n, hw, k_feat, cout):
    """Largest k dividing N with (k*Ho*Wo) sublane-aligned, sized from a VMEM budget."""
    lanes = ((k_feat + 127) // 128) * 128              # K axis is lane-padded in VMEM
    # double-buffered patches block (4 slabs, bf16) + double-buffered f32 output block
    bytes_per_row = 2 * 4 * lanes * 2 + 2 * cout * 4
    max_rows = max(hw, _VMEM_BLOCK_BUDGET // max(bytes_per_row, 1))
    k_max = max(1, min(n, max_rows // max(hw, 1)))
    for k in range(k_max, 0, -1):
        if n % k == 0 and (k * hw) % 8 == 0:
            return k
    return n   # single tile over everything: block == full array dims, always legal


@jax.jit
def generalized_convnet2(x, w, b, gamma, beta):
    """x: (N, Cin, H, W) f32; w: (Cout, Cin, 3, 3); b/gamma/beta: (Cout,).
    Returns (N, Cout, H//2, W//2) f32.
    NOTE: the conv bias `b` is exactly cancelled by the BatchNorm batch-mean
    subtraction, so it is ignored (mathematically identical forward)."""
    del b
    N, Cin, H, W = x.shape
    Cout = w.shape[0]
    assert H % 2 == 0 and W % 2 == 0, "even spatial dims required (MaxPool2d(2))"
    Ho, Wo = H // 2, W // 2
    HW = Ho * Wo
    K = Cin * 9
    M = N * HW                                        # pooled pixels = conv pixels / 4

    # --- glue: bf16 im2col patches, grouped by 2x2 pool position, ONE big transpose --
    xb = x.astype(jnp.bfloat16)                       # cast before materializing 9x data
    xpad = jnp.pad(xb, ((0, 0), (0, 0), (1, 1), (1, 1)))
    rows = [jnp.stack([xpad[:, :, kh:kh + H, kw:kw + W] for kw in range(3)], axis=2)
            for kh in range(3)]
    pt = jnp.stack(rows, axis=2)                      # (N, Cin, 3, 3, H, W)
    pt = pt.reshape(N, Cin, 3, 3, Ho, 2, Wo, 2)       # split H,W into (out, pool pos)
    pt = pt.transpose(5, 7, 0, 4, 6, 1, 2, 3)         # (dh, dw, N, Ho, Wo, Cin, 3, 3)
    patches = pt.reshape(4, M, K)                     # k = ci*9 + kh*3 + kw

    wmat = w.reshape(Cout, K).T.astype(jnp.bfloat16)  # (K, Cout), cols = (ci, kh, kw)

    # --- tiling: k whole images per grid step (NCHW-contiguous output blocks) -------
    k_img = _pick_images_per_tile(N, HW, K, Cout)
    tm = k_img * HW                                   # conv rows per pool slab per tile
    T = N // k_img
    cparams = pltpu.CompilerParams(
        dimension_semantics=("parallel",),
        vmem_limit_bytes=_VMEM_LIMIT,
    )

    # --- pass 1: per-tile partial sums for BatchNorm batch statistics ---------------
    stats = pl.pallas_call(
        _stats_kernel,
        out_shape=jax.ShapeDtypeStruct((T, 2, Cout), jnp.float32),
        grid=(T,),
        in_specs=[
            pl.BlockSpec((4, tm, K), lambda t: (0, t, 0)),
            pl.BlockSpec((K, Cout), lambda t: (0, 0)),
        ],
        out_specs=pl.BlockSpec((1, 2, Cout), lambda t: (t, 0, 0)),
        compiler_params=cparams,
    )(patches, wmat)

    # --- finalize BN statistics (tiny) and fold into per-channel scale / shift ------
    sums = jnp.sum(stats, axis=0)                     # (2, Cout)
    count = jnp.float32(4 * M)                        # N*H*W conv pixels per channel
    mean = sums[0] / count
    var = jnp.maximum(sums[1] / count - mean * mean, 0.0)   # biased var (train mode)
    rstd = jax.lax.rsqrt(var + EPS)
    g = gamma.astype(jnp.float32)
    scale = (g * rstd).reshape(1, Cout)
    shift = (beta.astype(jnp.float32) - mean * g * rstd).reshape(1, Cout)
    # TODO(synk): running_mean/running_var buffer updates (training-mode side effect
    # of nn.BatchNorm2d) are not emitted; only the forward activation is produced.

    # --- pass 2: conv (recomputed) + BN + ReLU + MaxPool2, written directly as NCHW --
    out = pl.pallas_call(
        _apply_kernel,
        out_shape=jax.ShapeDtypeStruct((N, Cout, HW), jnp.float32),
        grid=(T,),
        in_specs=[
            pl.BlockSpec((4, tm, K), lambda t: (0, t, 0)),
            pl.BlockSpec((K, Cout), lambda t: (0, 0)),
            pl.BlockSpec((1, Cout), lambda t: (0, 0)),
            pl.BlockSpec((1, Cout), lambda t: (0, 0)),
        ],
        out_specs=pl.BlockSpec((k_img, Cout, HW), lambda t: (t, 0, 0)),
        compiler_params=cparams,
    )(patches, wmat, scale, shift)

    return out.reshape(N, Cout, Ho, Wo)               # free reshape: already NCHW


if __name__ == "__main__":
    key = jax.random.PRNGKey(0)
    k_x, k_w, k_b = jax.random.split(key, 3)

    # small shapes consistent with the module: x_dim=3, hid_dim=64
    N, Cin, H, W = 2, 3, 16, 16
    Cout = 64

    x = jax.random.normal(k_x, (N, Cin, H, W), jnp.float32)

    # deterministic parameter init (PyTorch Conv2d-style uniform bounds; BN gamma=1, beta=0)
    fan_in = Cin * 3 * 3
    bound = 1.0 / (fan_in ** 0.5)
    w = jax.random.uniform(k_w, (Cout, Cin, 3, 3), jnp.float32, -bound, bound)
    b = jax.random.uniform(k_b, (Cout,), jnp.float32, -bound, bound)
    gamma = jnp.ones((Cout,), jnp.float32)
    beta = jnp.zeros((Cout,), jnp.float32)

    out = generalized_convnet2(x, w, b, gamma, beta)
    jax.block_until_ready(out)
    assert out.shape == (N, Cout, H // 2, W // 2)
    assert out.dtype == jnp.float32
    print("KERNEL_OK")
</pallas_src>

<mosaic_0001>
module attributes {stable_mosaic.version = 11 : i64} {
  func.func @_stats_kernel(%arg0: i32, %arg1: memref<4x128x27xbf16, #tpu.memory_space<vmem>>, %arg2: memref<27x64xbf16, #tpu.memory_space<vmem>>, %arg3: memref<1x2x64xf32, #tpu.memory_space<vmem>>) attributes {dimension_semantics = [#tpu.dimension_semantics<parallel>], iteration_bounds = array<i64: 1>, scalar_prefetch = 0 : i64, scratch_operands = 0 : i64, tpu.core_type = #tpu.core_type<tc>, window_params = [{transform_indices = @transform_0, window_bounds = array<i64: 4, 128, 27>}, {pipeline_mode = #tpu.pipeline_mode<synchronous>, transform_indices = @transform_1, window_bounds = array<i64: 27, 64>}, {transform_indices = @transform_2, window_bounds = array<i64: 1, 2, 64>}]} {
    %c0 = arith.constant 0 : index
    %c0_0 = arith.constant 0 : index
    %0 = vector.load %arg2[%c0, %c0_0] : memref<27x64xbf16, #tpu.memory_space<vmem>>, vector<27x64xbf16>
    %cst = arith.constant 0.000000e+00 : f32
    %1 = vector.broadcast %cst : f32 to vector<1x64xf32>
    %cst_1 = arith.constant 0.000000e+00 : f32
    %2 = vector.broadcast %cst_1 : f32 to vector<1x64xf32>
    %c0_2 = arith.constant 0 : index
    %c0_3 = arith.constant 0 : index
    %c0_4 = arith.constant 0 : index
    %3 = vector.load %arg1[%c0_2, %c0_3, %c0_4] : memref<4x128x27xbf16, #tpu.memory_space<vmem>>, vector<1x128x27xbf16>
    %4 = vector.shape_cast %3 : vector<1x128x27xbf16> to vector<128x27xbf16>
    %cst_5 = arith.constant dense<0.000000e+00> : vector<128x64xf32>
    %5 = tpu.matmul %4, %0, %cst_5 {dimension_numbers = #tpu.dot_dimension_numbers<[1], [0], [0], [1], [0, 0, 1, 1], [], []>} : vector<128x27xbf16>, vector<27x64xbf16>, vector<128x64xf32> -> vector<128x64xf32>
    %cst_6 = arith.constant dense<0.000000e+00> : vector<64xf32>
    %6 = vector.multi_reduction <add>, %5, %cst_6 [0] : vector<128x64xf32> to vector<64xf32>
    %7 = vector.shape_cast %6 : vector<64xf32> to vector<1x64xf32>
    %8 = arith.addf %1, %7 : vector<1x64xf32>
    %9 = arith.mulf %5, %5 : vector<128x64xf32>
    %cst_7 = arith.constant dense<0.000000e+00> : vector<64xf32>
    %10 = vector.multi_reduction <add>, %9, %cst_7 [0] : vector<128x64xf32> to vector<64xf32>
    %11 = vector.shape_cast %10 : vector<64xf32> to vector<1x64xf32>
    %12 = arith.addf %2, %11 : vector<1x64xf32>
    %c1 = arith.constant 1 : index
    %c0_8 = arith.constant 0 : index
    %c0_9 = arith.constant 0 : index
    %13 = vector.load %arg1[%c1, %c0_8, %c0_9] : memref<4x128x27xbf16, #tpu.memory_space<vmem>>, vector<1x128x27xbf16>
    %14 = vector.shape_cast %13 : vector<1x128x27xbf16> to vector<128x27xbf16>
    %cst_10 = arith.constant dense<0.000000e+00> : vector<128x64xf32>
    %15 = tpu.matmul %14, %0, %cst_10 {dimension_numbers = #tpu.dot_dimension_numbers<[1], [0], [0], [1], [0, 0, 1, 1], [], []>} : vector<128x27xbf16>, vector<27x64xbf16>, vector<128x64xf32> -> vector<128x64xf32>
    %cst_11 = arith.constant dense<0.000000e+00> : vector<64xf32>
    %16 = vector.multi_reduction <add>, %15, %cst_11 [0] : vector<128x64xf32> to vector<64xf32>
    %17 = vector.shape_cast %16 : vector<64xf32> to vector<1x64xf32>
    %18 = arith.addf %8, %17 : vector<1x64xf32>
    %19 = arith.mulf %15, %15 : vector<128x64xf32>
    %cst_12 = arith.constant dense<0.000000e+00> : vector<64xf32>
    %20 = vector.multi_reduction <add>, %19, %cst_12 [0] : vector<128x64xf32> to vector<64xf32>
    %21 = vector.shape_cast %20 : vector<64xf32> to vector<1x64xf32>
    %22 = arith.addf %12, %21 : vector<1x64xf32>
    %c2 = arith.constant 2 : index
    %c0_13 = arith.constant 0 : index
    %c0_14 = arith.constant 0 : index
    %23 = vector.load %arg1[%c2, %c0_13, %c0_14] : memref<4x128x27xbf16, #tpu.memory_space<vmem>>, vector<1x128x27xbf16>
    %24 = vector.shape_cast %23 : vector<1x128x27xbf16> to vector<128x27xbf16>
    %cst_15 = arith.constant dense<0.000000e+00> : vector<128x64xf32>
    %25 = tpu.matmul %24, %0, %cst_15 {dimension_numbers = #tpu.dot_dimension_numbers<[1], [0], [0], [1], [0, 0, 1, 1], [], []>} : vector<128x27xbf16>, vector<27x64xbf16>, vector<128x64xf32> -> vector<128x64xf32>
    %cst_16 = arith.constant dense<0.000000e+00> : vector<64xf32>
    %26 = vector.multi_reduction <add>, %25, %cst_16 [0] : vector<128x64xf32> to vector<64xf32>
    %27 = vector.shape_cast %26 : vector<64xf32> to vector<1x64xf32>
    %28 = arith.addf %18, %27 : vector<1x64xf32>
    %29 = arith.mulf %25, %25 : vector<128x64xf32>
    %cst_17 = arith.constant dense<0.000000e+00> : vector<64xf32>
    %30 = vector.multi_reduction <add>, %29, %cst_17 [0] : vector<128x64xf32> to vector<64xf32>
    %31 = vector.shape_cast %30 : vector<64xf32> to vector<1x64xf32>
    %32 = arith.addf %22, %31 : vector<1x64xf32>
    %c3 = arith.constant 3 : index
    %c0_18 = arith.constant 0 : index
    %c0_19 = arith.constant 0 : index
    %33 = vector.load %arg1[%c3, %c0_18, %c0_19] : memref<4x128x27xbf16, #tpu.memory_space<vmem>>, vector<1x128x27xbf16>
    %34 = vector.shape_cast %33 : vector<1x128x27xbf16> to vector<128x27xbf16>
    %cst_20 = arith.constant dense<0.000000e+00> : vector<128x64xf32>
    %35 = tpu.matmul %34, %0, %cst_20 {dimension_numbers = #tpu.dot_dimension_numbers<[1], [0], [0], [1], [0, 0, 1, 1], [], []>} : vector<128x27xbf16>, vector<27x64xbf16>, vector<128x64xf32> -> vector<128x64xf32>
    %cst_21 = arith.constant dense<0.000000e+00> : vector<64xf32>
    %36 = vector.multi_reduction <add>, %35, %cst_21 [0] : vector<128x64xf32> to vector<64xf32>
    %37 = vector.shape_cast %36 : vector<64xf32> to vector<1x64xf32>
    %38 = arith.addf %28, %37 : vector<1x64xf32>
    %39 = arith.mulf %35, %35 : vector<128x64xf32>
    %cst_22 = arith.constant dense<0.000000e+00> : vector<64xf32>
    %40 = vector.multi_reduction <add>, %39, %cst_22 [0] : vector<128x64xf32> to vector<64xf32>
    %41 = vector.shape_cast %40 : vector<64xf32> to vector<1x64xf32>
    %42 = arith.addf %32, %41 : vector<1x64xf32>
    %43 = tpu.concatenate %38, %42 in 0 : vector<1x64xf32>, vector<1x64xf32> -> vector<2x64xf32>
    %c0_23 = arith.constant 0 : index
    %c0_24 = arith.constant 0 : index
    %c0_25 = arith.constant 0 : index
    %44 = vector.load %arg3[%c0_23, %c0_24, %c0_25] : memref<1x2x64xf32, #tpu.memory_space<vmem>>, vector<1x2x64xf32>
    %45 = vector.shape_cast %44 : vector<1x2x64xf32> to vector<2x64xf32>
    %46 = vector.shape_cast %43 : vector<2x64xf32> to vector<1x2x64xf32>
    tpu.vector_store %arg3[%c0_23, %c0_24, %c0_25], %46 {strides = array<i32>} : memref<1x2x64xf32, #tpu.memory_space<vmem>>, vector<1x2x64xf32>,
    return
  }
  func.func @transform_0(%arg0: i32) -> (i32, i32, i32) {
    %c0_i32 = arith.constant 0 : i32
    %c0_i32_0 = arith.constant 0 : i32
    %c0_i32_1 = arith.constant 0 : i32
    return %c0_i32, %arg0, %c0_i32_0 : i32, i32, i32
  }
  func.func @transform_1(%arg0: i32) -> (i32, i32) {
    %c0_i32 = arith.constant 0 : i32
    %c0_i32_0 = arith.constant 0 : i32
    %c0_i32_1 = arith.constant 0 : i32
    return %c0_i32, %c0_i32_0 : i32, i32
  }
  func.func @transform_2(%arg0: i32) -> (i32, i32, i32) {
    %c0_i32 = arith.constant 0 : i32
    %c0_i32_0 = arith.constant 0 : i32
    %c0_i32_1 = arith.constant 0 : i32
    return %arg0, %c0_i32, %c0_i32_0 : i32, i32, i32
  }
}

module attributes {stable_mosaic.version = 11 : i64} {
  func.func @_apply_kernel(%arg0: i32, %arg1: memref<4x128x27xbf16, #tpu.memory_space<vmem>>, %arg2: memref<27x64xbf16, #tpu.memory_space<vmem>>, %arg3: memref<1x64xf32, #tpu.memory_space<vmem>>, %arg4: memref<1x64xf32, #tpu.memory_space<vmem>>, %arg5: memref<2x64x64xf32, #tpu.memory_space<vmem>>) attributes {dimension_semantics = [#tpu.dimension_semantics<parallel>], iteration_bounds = array<i64: 1>, scalar_prefetch = 0 : i64, scratch_operands = 0 : i64, tpu.core_type = #tpu.core_type<tc>, window_params = [{transform_indices = @transform_0, window_bounds = array<i64: 4, 128, 27>}, {pipeline_mode = #tpu.pipeline_mode<synchronous>, transform_indices = @transform_1, window_bounds = array<i64: 27, 64>}, {pipeline_mode = #tpu.pipeline_mode<synchronous>, transform_indices = @transform_2, window_bounds = array<i64: 1, 64>}, {pipeline_mode = #tpu.pipeline_mode<synchronous>, transform_indices = @transform_3, window_bounds = array<i64: 1, 64>}, {transform_indices = @transform_4, window_bounds = array<i64: 2, 64, 64>}]} {
    %c0 = arith.constant 0 : index
    %c0_0 = arith.constant 0 : index
    %0 = vector.load %arg2[%c0, %c0_0] : memref<27x64xbf16, #tpu.memory_space<vmem>>, vector<27x64xbf16>
    %c0_1 = arith.constant 0 : index
    %c0_2 = arith.constant 0 : index
    %1 = vector.load %arg3[%c0_1, %c0_2] : memref<1x64xf32, #tpu.memory_space<vmem>>, vector<1x64xf32>
    %c0_3 = arith.constant 0 : index
    %c0_4 = arith.constant 0 : index
    %2 = vector.load %arg4[%c0_3, %c0_4] : memref<1x64xf32, #tpu.memory_space<vmem>>, vector<1x64xf32>
    %c0_5 = arith.constant 0 : index
    %c0_6 = arith.constant 0 : index
    %c0_7 = arith.constant 0 : index
    %3 = vector.load %arg1[%c0_5, %c0_6, %c0_7] : memref<4x128x27xbf16, #tpu.memory_space<vmem>>, vector<1x128x27xbf16>
    %4 = vector.shape_cast %3 : vector<1x128x27xbf16> to vector<128x27xbf16>
    %cst = arith.constant dense<0.000000e+00> : vector<128x64xf32>
    %5 = tpu.matmul %4, %0, %cst {dimension_numbers = #tpu.dot_dimension_numbers<[1], [0], [0], [1], [0, 0, 1, 1], [], []>} : vector<128x27xbf16>, vector<27x64xbf16>, vector<128x64xf32> -> vector<128x64xf32>
    %6 = vector.broadcast %1 : vector<1x64xf32> to vector<128x64xf32>
    %7 = arith.mulf %5, %6 : vector<128x64xf32>
    %8 = vector.broadcast %2 : vector<1x64xf32> to vector<128x64xf32>
    %9 = arith.addf %7, %8 : vector<128x64xf32>
    %cst_8 = arith.constant 0.000000e+00 : f32
    %10 = vector.broadcast %cst_8 : f32 to vector<128x64xf32>
    %11 = arith.maximumf %9, %10 : vector<128x64xf32>
    %c1 = arith.constant 1 : index
    %c0_9 = arith.constant 0 : index
    %c0_10 = arith.constant 0 : index
    %12 = vector.load %arg1[%c1, %c0_9, %c0_10] : memref<4x128x27xbf16, #tpu.memory_space<vmem>>, vector<1x128x27xbf16>
    %13 = vector.shape_cast %12 : vector<1x128x27xbf16> to vector<128x27xbf16>
    %cst_11 = arith.constant dense<0.000000e+00> : vector<128x64xf32>
    %14 = tpu.matmul %13, %0, %cst_11 {dimension_numbers = #tpu.dot_dimension_numbers<[1], [0], [0], [1], [0, 0, 1, 1], [], []>} : vector<128x27xbf16>, vector<27x64xbf16>, vector<128x64xf32> -> vector<128x64xf32>
    %15 = vector.broadcast %1 : vector<1x64xf32> to vector<128x64xf32>
    %16 = arith.mulf %14, %15 : vector<128x64xf32>
    %17 = vector.broadcast %2 : vector<1x64xf32> to vector<128x64xf32>
    %18 = arith.addf %16, %17 : vector<128x64xf32>
    %cst_12 = arith.constant 0.000000e+00 : f32
    %19 = vector.broadcast %cst_12 : f32 to vector<128x64xf32>
    %20 = arith.maximumf %18, %19 : vector<128x64xf32>
    %21 = arith.maximumf %11, %20 : vector<128x64xf32>
    %c2 = arith.constant 2 : index
    %c0_13 = arith.constant 0 : index
    %c0_14 = arith.constant 0 : index
    %22 = vector.load %arg1[%c2, %c0_13, %c0_14] : memref<4x128x27xbf16, #tpu.memory_space<vmem>>, vector<1x128x27xbf16>
    %23 = vector.shape_cast %22 : vector<1x128x27xbf16> to vector<128x27xbf16>
    %cst_15 = arith.constant dense<0.000000e+00> : vector<128x64xf32>
    %24 = tpu.matmul %23, %0, %cst_15 {dimension_numbers = #tpu.dot_dimension_numbers<[1], [0], [0], [1], [0, 0, 1, 1], [], []>} : vector<128x27xbf16>, vector<27x64xbf16>, vector<128x64xf32> -> vector<128x64xf32>
    %25 = vector.broadcast %1 : vector<1x64xf32> to vector<128x64xf32>
    %26 = arith.mulf %24, %25 : vector<128x64xf32>
    %27 = vector.broadcast %2 : vector<1x64xf32> to vector<128x64xf32>
    %28 = arith.addf %26, %27 : vector<128x64xf32>
    %cst_16 = arith.constant 0.000000e+00 : f32
    %29 = vector.broadcast %cst_16 : f32 to vector<128x64xf32>
    %30 = arith.maximumf %28, %29 : vector<128x64xf32>
    %31 = arith.maximumf %21, %30 : vector<128x64xf32>
    %c3 = arith.constant 3 : index
    %c0_17 = arith.constant 0 : index
    %c0_18 = arith.constant 0 : index
    %32 = vector.load %arg1[%c3, %c0_17, %c0_18] : memref<4x128x27xbf16, #tpu.memory_space<vmem>>, vector<1x128x27xbf16>
    %33 = vector.shape_cast %32 : vector<1x128x27xbf16> to vector<128x27xbf16>
    %cst_19 = arith.constant dense<0.000000e+00> : vector<128x64xf32>
    %34 = tpu.matmul %33, %0, %cst_19 {dimension_numbers = #tpu.dot_dimension_numbers<[1], [0], [0], [1], [0, 0, 1, 1], [], []>} : vector<128x27xbf16>, vector<27x64xbf16>, vector<128x64xf32> -> vector<128x64xf32>
    %35 = vector.broadcast %1 : vector<1x64xf32> to vector<128x64xf32>
    %36 = arith.mulf %34, %35 : vector<128x64xf32>
    %37 = vector.broadcast %2 : vector<1x64xf32> to vector<128x64xf32>
    %38 = arith.addf %36, %37 : vector<128x64xf32>
    %cst_20 = arith.constant 0.000000e+00 : f32
    %39 = vector.broadcast %cst_20 : f32 to vector<128x64xf32>
    %40 = arith.maximumf %38, %39 : vector<128x64xf32>
    %41 = arith.maximumf %31, %40 : vector<128x64xf32>
    %42 = vector.extract_strided_slice %41 {offsets = [0, 0], sizes = [64, 64], strides = [1, 1]} : vector<128x64xf32> to vector<64x64xf32>
    %43 = tpu.transpose %42, [1, 0] : vector<64x64xf32> -> vector<64x64xf32>
    %c0_21 = arith.constant 0 : index
    %c0_22 = arith.constant 0 : index
    %c0_23 = arith.constant 0 : index
    %44 = vector.load %arg5[%c0_21, %c0_22, %c0_23] : memref<2x64x64xf32, #tpu.memory_space<vmem>>, vector<1x64x64xf32>
    %45 = vector.shape_cast %44 : vector<1x64x64xf32> to vector<64x64xf32>
    %46 = vector.shape_cast %43 : vector<64x64xf32> to vector<1x64x64xf32>
    tpu.vector_store %arg5[%c0_21, %c0_22, %c0_23], %46 {strides = array<i32>} : memref<2x64x64xf32, #tpu.memory_space<vmem>>, vector<1x64x64xf32>,
    %47 = vector.extract_strided_slice %41 {offsets = [64, 0], sizes = [64, 64], strides = [1, 1]} : vector<128x64xf32> to vector<64x64xf32>
    %48 = tpu.transpose %47, [1, 0] : vector<64x64xf32> -> vector<64x64xf32>
    %c1_24 = arith.constant 1 : index
    %c0_25 = arith.constant 0 : index
    %c0_26 = arith.constant 0 : index
    %49 = vector.load %arg5[%c1_24, %c0_25, %c0_26] : memref<2x64x64xf32, #tpu.memory_space<vmem>>, vector<1x64x64xf32>
    %50 = vector.shape_cast %49 : vector<1x64x64xf32> to vector<64x64xf32>
    %51 = vector.shape_cast %48 : vector<64x64xf32> to vector<1x64x64xf32>
    tpu.vector_store %arg5[%c1_24, %c0_25, %c0_26], %51 {strides = array<i32>} : memref<2x64x64xf32, #tpu.memory_space<vmem>>, vector<1x64x64xf32>,
    return
  }
  func.func @transform_0(%arg0: i32) -> (i32, i32, i32) {
    %c0_i32 = arith.constant 0 : i32
    %c0_i32_0 = arith.constant 0 : i32
    %c0_i32_1 = arith.constant 0 : i32
    return %c0_i32, %arg0, %c0_i32_0 : i32, i32, i32
  }
  func.func @transform_1(%arg0: i32) -> (i32, i32) {
    %c0_i32 = arith.constant 0 : i32
    %c0_i32_0 = arith.constant 0 : i32
    %c0_i32_1 = arith.constant 0 : i32
    return %c0_i32, %c0_i32_0 : i32, i32
  }
  func.func @transform_2(%arg0: i32) -> (i32, i32) {
    %c0_i32 = arith.constant 0 : i32
    %c0_i32_0 = arith.constant 0 : i32
    %c0_i32_1 = arith.constant 0 : i32
    return %c0_i32, %c0_i32_0 : i32, i32
  }
  func.func @transform_3(%arg0: i32) -> (i32, i32) {
    %c0_i32 = arith.constant 0 : i32
    %c0_i32_0 = arith.constant 0 : i32
    %c0_i32_1 = arith.constant 0 : i32
    return %c0_i32, %c0_i32_0 : i32, i32
  }
  func.func @transform_4(%arg0: i32) -> (i32, i32, i32) {
    %c0_i32 = arith.constant 0 : i32
    %c0_i32_0 = arith.constant 0 : i32
    %c0_i32_1 = arith.constant 0 : i32
    return %arg0, %c0_i32, %c0_i32_0 : i32, i32, i32
  }
}

</mosaic_0001>

<bundles_post_ra>
// kernel: generalized_convnet2.2
= control target key start
LH: loop header
LB: loop body
LE: loop exit
PB: predicated region body
PF: predicated region fallthrough
CT: control target
= control target key end

     0   :  { %vm108_vm0 = vcmask 1044480   ;;  %vm109_vm1 = vcmask 1045504   ;;  %v1182_v2 = vmov 65535   ;;  %vm83_vm2 = vcmask 220160   ;;  %s1531_s1 = inlined_call_operand.vmem [shape: bf16[27,64], index: 1, kind: input, shape index: {}]   ;;  %s1532_s0 = inlined_call_operand.vmem [shape: bf16[4,128,27], index: 0, kind: input, shape index: {}]   ;;  %s1533_s2 = inlined_call_operand.vmem [shape: f32[1,2,64], index: 2, kind: output, shape index: {}]  }
   0x1   :  { %v969_v0 = vld [vmem:[%s1531_s1 + $0x8] sm:$0xf]  ;;  %v1148_v1 = vld [vmem:[%s1531_s1 + $0x8] sm:$0x30]  ;;  %v110_v3 = vsel %vm108_vm0, 4294967295, %v1182_v2  ;;  %v1147_v7 = vld [vmem:[%s1531_s1] sm:$0xff] }
   0x2   :  { %v970_v4 = vor.u32 %v1148_v1, %v969_v0  ;;  %v111_v5 = vsel %vm109_vm1, %v110_v3, 0  ;;  %v1149_v8 = vld [vmem:[%s1532_s0] sm:$0xff]  ;;  %v1150_v12 = vld [vmem:[%s1532_s0 + $0x8] sm:$0xff]  ;;  %v1151_v16 = vld [vmem:[%s1532_s0 + $0x10] sm:$0xff]  ;;  %vm164_vm3 = vcmask 523264   ;;  %vm923_vm4 = vcmask 1040384  }
   0x3   :  { %v1157_v9 = vld [vmem:[%s1532_s0 + $0x40] sm:$0xff]  ;;  %v1158_v13 = vld [vmem:[%s1532_s0 + $0x48] sm:$0xff]  ;;  %v1159_v17 = vld [vmem:[%s1532_s0 + $0x50] sm:$0xff]  ;;  %vm925_vm5 = vcmask 517120  }
   0x4   :  { %v113_v6 = vand.u32 %v970_v4, %v111_v5  ;;  %v1165_v10 = vld [vmem:[%s1532_s0 + $0x80] sm:$0xff]  ;;  %v1166_v14 = vld [vmem:[%s1532_s0 + $0x88] sm:$0xff]  ;;  %v1167_v18 = vld [vmem:[%s1532_s0 + $0x90] sm:$0xff] }
   0x5   :  { %v1173_v11 = vld [vmem:[%s1532_s0 + $0xc0] sm:$0xff]  ;;  %v1174_v15 = vld [vmem:[%s1532_s0 + $0xc8] sm:$0xff]  ;;  %v1175_v19 = vld [vmem:[%s1532_s0 + $0xd0] sm:$0xff] }
   0x6   :  { %121 = vmatpush.bf16.msra.mxu0 %v113_v6  ;;  %344 = vmatpush.bf16.msra.mxu1 %v113_v6  ;;  %v1152_v20 = vld [vmem:[%s1532_s0 + $0x18] sm:$0xff]  ;;  %v1153_v24 = vld [vmem:[%s1532_s0 + $0x20] sm:$0xff]  ;;  %v1154_v28 = vld [vmem:[%s1532_s0 + $0x28] sm:$0xff] }
   0x7   :  { %566 = vmatpush.bf16.msra.mxu2 %v113_v6  ;;  %788 = vmatpush.bf16.msra.mxu3 %v113_v6  ;;  %v1160_v21 = vld [vmem:[%s1532_s0 + $0x58] sm:$0xff]  ;;  %v1161_v25 = vld [vmem:[%s1532_s0 + $0x60] sm:$0xff]  ;;  %v1162_v29 = vld [vmem:[%s1532_s0 + $0x68] sm:$0xff] }
   0x8   :  { %v1168_v22 = vld [vmem:[%s1532_s0 + $0x98] sm:$0xff]  ;;  %v1169_v26 = vld [vmem:[%s1532_s0 + $0xa0] sm:$0xff]  ;;  %v1170_v30 = vld [vmem:[%s1532_s0 + $0xa8] sm:$0xff] }
   0x9   :  { %v1176_v23 = vld [vmem:[%s1532_s0 + $0xd8] sm:$0xff]  ;;  %v1177_v27 = vld [vmem:[%s1532_s0 + $0xe0] sm:$0xff]  ;;  %v1178_v31 = vld [vmem:[%s1532_s0 + $0xe8] sm:$0xff] }
   0xa   :  { %122 = vmatpush.bf16.msra.mxu0 %v1147_v7  ;;  %345 = vmatpush.bf16.msra.mxu1 %v1147_v7  ;;  %v1155_v32 = vld [vmem:[%s1532_s0 + $0x30] sm:$0xff]  ;;  %v1156_v36 = vld [vmem:[%s1532_s0 + $0x38] sm:$0xff] }
   0xb   :  { %567 = vmatpush.bf16.msra.mxu2 %v1147_v7  ;;  %789 = vmatpush.bf16.msra.mxu3 %v1147_v7  ;;  %v1163_v33 = vld [vmem:[%s1532_s0 + $0x70] sm:$0xff]  ;;  %v1164_v37 = vld [vmem:[%s1532_s0 + $0x78] sm:$0xff] }
   0xc   :  { %v1171_v34 = vld [vmem:[%s1532_s0 + $0xb0] sm:$0xff]  ;;  %v1172_v38 = vld [vmem:[%s1532_s0 + $0xb8] sm:$0xff] }
   0xd   :  { %971 = vmatmul.msk.bf16.vlgmr.msra.gmra.mxu0 %vm83_vm2, %v1149_v8  ;;  %1027 = vmatmul.msk.bf16.vlgmr.msra.gmra.mxu1 %vm83_vm2, %v1157_v9  ;;  %v1179_v35 = vld [vmem:[%s1532_s0 + $0xf0] sm:$0xff]  ;;  %v1180_v39 = vld [vmem:[%s1532_s0 + $0xf8] sm:$0xff] }
   0xe   :  { %1083 = vmatmul.msk.bf16.vlgmr.msra.gmra.mxu2 %vm83_vm2, %v1165_v10  ;;  %1139 = vmatmul.msk.bf16.vlgmr.msra.gmra.mxu3 %vm83_vm2, %v1173_v11 }
  0x1d   :  { %972 = vmatmul.msk.bf16.gmra.mxu0 %vm83_vm2, %v1150_v12  ;;  %1028 = vmatmul.msk.bf16.gmra.mxu1 %vm83_vm2, %v1158_v13 }
  0x1e   :  { %1084 = vmatmul.msk.bf16.gmra.mxu2 %vm83_vm2, %v1166_v14  ;;  %1140 = vmatmul.msk.bf16.gmra.mxu3 %vm83_vm2, %v1174_v15 }
  0x2d   :  { %973 = vmatmul.msk.bf16.gmra.mxu0 %vm83_vm2, %v1151_v16  ;;  %1029 = vmatmul.msk.bf16.gmra.mxu1 %vm83_vm2, %v1159_v17 }
  0x2e   :  { %1085 = vmatmul.msk.bf16.gmra.mxu2 %vm83_vm2, %v1167_v18  ;;  %1141 = vmatmul.msk.bf16.gmra.mxu3 %vm83_vm2, %v1175_v19 }
  0x3d   :  { %974 = vmatmul.msk.bf16.gmra.mxu0 %vm83_vm2, %v1152_v20  ;;  %1030 = vmatmul.msk.bf16.gmra.mxu1 %vm83_vm2, %v1160_v21 }
  0x3e   :  { %1086 = vmatmul.msk.bf16.gmra.mxu2 %vm83_vm2, %v1168_v22  ;;  %1142 = vmatmul.msk.bf16.gmra.mxu3 %vm83_vm2, %v1176_v23 }
  0x4d   :  { %975 = vmatmul.msk.bf16.gmra.mxu0 %vm83_vm2, %v1153_v24  ;;  %1031 = vmatmul.msk.bf16.gmra.mxu1 %vm83_vm2, %v1161_v25 }
  0x4e   :  { %1087 = vmatmul.msk.bf16.gmra.mxu2 %vm83_vm2, %v1169_v26  ;;  %1143 = vmatmul.msk.bf16.gmra.mxu3 %vm83_vm2, %v1177_v27 }
  0x5d   :  { %976 = vmatmul.msk.bf16.gmra.mxu0 %vm83_vm2, %v1154_v28  ;;  %1032 = vmatmul.msk.bf16.gmra.mxu1 %vm83_vm2, %v1162_v29 }
  0x5e   :  { %1088 = vmatmul.msk.bf16.gmra.mxu2 %vm83_vm2, %v1170_v30  ;;  %1144 = vmatmul.msk.bf16.gmra.mxu3 %vm83_vm2, %v1178_v31 }
  0x6d   :  { %977 = vmatmul.msk.bf16.gmra.mxu0 %vm83_vm2, %v1155_v32  ;;  %1033 = vmatmul.msk.bf16.gmra.mxu1 %vm83_vm2, %v1163_v33 }
  0x6e   :  { %1089 = vmatmul.msk.bf16.gmra.mxu2 %vm83_vm2, %v1171_v34  ;;  %1145 = vmatmul.msk.bf16.gmra.mxu3 %vm83_vm2, %v1179_v35 }
  0x7d   :  { %978 = vmatmul.msk.bf16.gmra.mxu0 %vm83_vm2, %v1156_v36  ;;  %1034 = vmatmul.msk.bf16.gmra.mxu1 %vm83_vm2, %v1164_v37 }
  0x7e   :  { %1090 = vmatmul.msk.bf16.gmra.mxu2 %vm83_vm2, %v1172_v38  ;;  %1146 = vmatmul.msk.bf16.gmra.mxu3 %vm83_vm2, %v1180_v39 }
  0x8a   :  { %v124_v40 = vpop.f32.mrf.mxu0  ;;  %v347_v41 = vpop.f32.mrf.mxu1 }
  0x8b   :  { %v203_v42 = vmul.f32 %v124_v40, %v124_v40  ;;  %v425_v43 = vmul.f32 %v347_v41, %v347_v41  ;;  %v165_v46 = vsel %vm164_vm3, %v124_v40, 0.0  ;;  %v387_v47 = vsel %vm164_vm3, %v347_v41, 0.0 }
  0x8d   :  { %v219_v54 = vsel %vm164_vm3, %v203_v42, 0.0  ;;  %v441_v55 = vsel %vm164_vm3, %v425_v43, 0.0 }
  0x91   :  { %v569_v44 = vpop.f32.mrf.mxu2  ;;  %v791_v45 = vpop.f32.mrf.mxu3 }
  0x92   :  { %v126_v48 = vpop.f32.mrf.mxu0  ;;  %v349_v49 = vpop.f32.mrf.mxu1  ;;  %v647_v58 = vmul.f32 %v569_v44, %v569_v44  ;;  %v869_v59 = vmul.f32 %v791_v45, %v791_v45  ;;  %v609_v0 = vsel %vm164_vm3, %v569_v44, 0.0  ;;  %v831_v2 = vsel %vm164_vm3, %v791_v45, 0.0 }
  0x93   :  { %v166_v50 = vsel %vm164_vm3, %v126_v48, 0.0  ;;  %v204_v51 = vmul.f32 %v126_v48, %v126_v48  ;;  %v388_v52 = vsel %vm164_vm3, %v349_v49, 0.0  ;;  %v426_v53 = vmul.f32 %v349_v49, %v349_v49 }
  0x94   :  { %v167_v56 = vadd.f32 %v166_v50, %v165_v46  ;;  %v389_v57 = vadd.f32 %v388_v52, %v387_v47  ;;  %v663_v1 = vsel %vm164_vm3, %v647_v58, 0.0  ;;  %v885_v3 = vsel %vm164_vm3, %v869_v59, 0.0 }
  0x95   :  { %v220_v60 = vsel %vm164_vm3, %v204_v51, 0.0  ;;  %v442_v61 = vsel %vm164_vm3, %v426_v53, 0.0 }
  0x96   :  { %v221_v62 = vadd.f32 %v220_v60, %v219_v54  ;;  %v443_v63 = vadd.f32 %v442_v61, %v441_v55 }
  0x99   :  { %v571_v4 = vpop.f32.mrf.mxu2  ;;  %v793_v5 = vpop.f32.mrf.mxu3 }
  0x9a   :  { %v610_v6 = vsel %vm164_vm3, %v571_v4, 0.0  ;;  %v648_v7 = vmul.f32 %v571_v4, %v571_v4  ;;  %v832_v8 = vsel %vm164_vm3, %v793_v5, 0.0  ;;  %v870_v9 = vmul.f32 %v793_v5, %v793_v5  ;;  %v129_v10 = vpop.f32.mrf.mxu0  ;;  %v352_v11 = vpop.f32.mrf.mxu1 }
  0x9b   :  { %v611_v12 = vadd.f32 %v610_v6, %v609_v0  ;;  %v833_v13 = vadd.f32 %v832_v8, %v831_v2  ;;  %v168_v14 = vsel %vm164_vm3, %v129_v10, 0.0  ;;  %v205_v15 = vmul.f32 %v129_v10, %v129_v10 }
  0x9c   :  { %v664_v16 = vsel %vm164_vm3, %v648_v7, 0.0  ;;  %v886_v17 = vsel %vm164_vm3, %v870_v9, 0.0  ;;  %v169_v18 = vadd.f32 %v168_v14, %v167_v56  ;;  %v390_v19 = vsel %vm164_vm3, %v352_v11, 0.0 }
  0x9d   :  { %v665_v20 = vadd.f32 %v664_v16, %v663_v1  ;;  %v887_v21 = vadd.f32 %v886_v17, %v885_v3  ;;  %v222_v22 = vsel %vm164_vm3, %v205_v15, 0.0  ;;  %v391_v23 = vadd.f32 %v390_v19, %v389_v57 }
  0x9e   :  { %v223_v24 = vadd.f32 %v222_v22, %v221_v62  ;;  %v427_v25 = vmul.f32 %v352_v11, %v352_v11 }
  0xa0   :  { %v444_v26 = vsel %vm164_vm3, %v427_v25, 0.0 }
  0xa1   :  { %v445_v27 = vadd.f32 %v444_v26, %v443_v63  ;;  %v574_v28 = vpop.f32.mrf.mxu2  ;;  %v796_v29 = vpop.f32.mrf.mxu3 }
  0xa2   :  { %v612_v30 = vsel %vm164_vm3, %v574_v28, 0.0  ;;  %v649_v31 = vmul.f32 %v574_v28, %v574_v28  ;;  %v834_v32 = vsel %vm164_vm3, %v796_v29, 0.0  ;;  %v871_v33 = vmul.f32 %v796_v29, %v796_v29  ;;  %v131_v34 = vpop.f32.mrf.mxu0  ;;  %v354_v35 = vpop.f32.mrf.mxu1 }
  0xa3   :  { %v613_v36 = vadd.f32 %v612_v30, %v611_v12  ;;  %v835_v37 = vadd.f32 %v834_v32, %v833_v13  ;;  %v170_v38 = vsel %vm164_vm3, %v131_v34, 0.0  ;;  %v206_v39 = vmul.f32 %v131_v34, %v131_v34 }
  0xa4   :  { %v666_v40 = vsel %vm164_vm3, %v649_v31, 0.0  ;;  %v888_v41 = vsel %vm164_vm3, %v871_v33, 0.0  ;;  %v171_v42 = vadd.f32 %v170_v38, %v169_v18  ;;  %v392_v43 = vsel %vm164_vm3, %v354_v35, 0.0 }
  0xa5   :  { %v667_v44 = vadd.f32 %v666_v40, %v665_v20  ;;  %v889_v45 = vadd.f32 %v888_v41, %v887_v21  ;;  %v224_v46 = vsel %vm164_vm3, %v206_v39, 0.0  ;;  %v393_v47 = vadd.f32 %v392_v43, %v391_v23 }
  0xa6   :  { %v225_v48 = vadd.f32 %v224_v46, %v223_v24  ;;  %v428_v49 = vmul.f32 %v354_v35, %v354_v35 }
  0xa8   :  { %v446_v50 = vsel %vm164_vm3, %v428_v49, 0.0 }
  0xa9   :  { %v447_v51 = vadd.f32 %v446_v50, %v445_v27  ;;  %v576_v52 = vpop.f32.mrf.mxu2  ;;  %v798_v53 = vpop.f32.mrf.mxu3 }
  0xaa   :  { %v614_v54 = vsel %vm164_vm3, %v576_v52, 0.0  ;;  %v650_v55 = vmul.f32 %v576_v52, %v576_v52  ;;  %v836_v56 = vsel %vm164_vm3, %v798_v53, 0.0  ;;  %v872_v57 = vmul.f32 %v798_v53, %v798_v53  ;;  %v134_v58 = vpop.f32.mrf.mxu0  ;;  %v357_v59 = vpop.f32.mrf.mxu1 }
  0xab   :  { %v615_v60 = vadd.f32 %v614_v54, %v613_v36  ;;  %v837_v61 = vadd.f32 %v836_v56, %v835_v37  ;;  %v172_v62 = vsel %vm164_vm3, %v134_v58, 0.0  ;;  %v207_v63 = vmul.f32 %v134_v58, %v134_v58 }
  0xac   :  { %v668_v0 = vsel %vm164_vm3, %v650_v55, 0.0  ;;  %v890_v1 = vsel %vm164_vm3, %v872_v57, 0.0  ;;  %v173_v2 = vadd.f32 %v172_v62, %v171_v42  ;;  %v394_v3 = vsel %vm164_vm3, %v357_v59, 0.0 }
  0xad   :  { %v669_v4 = vadd.f32 %v668_v0, %v667_v44  ;;  %v891_v5 = vadd.f32 %v890_v1, %v889_v45  ;;  %v226_v6 = vsel %vm164_vm3, %v207_v63, 0.0  ;;  %v395_v7 = vadd.f32 %v394_v3, %v393_v47 }
  0xae   :  { %v227_v8 = vadd.f32 %v226_v6, %v225_v48  ;;  %v429_v9 = vmul.f32 %v357_v59, %v357_v59 }
  0xb0   :  { %v448_v10 = vsel %vm164_vm3, %v429_v9, 0.0 }
  0xb1   :  { %v449_v11 = vadd.f32 %v448_v10, %v447_v51  ;;  %v579_v12 = vpop.f32.mrf.mxu2  ;;  %v801_v13 = vpop.f32.mrf.mxu3 }
  0xb2   :  { %v616_v14 = vsel %vm164_vm3, %v579_v12, 0.0  ;;  %v651_v15 = vmul.f32 %v579_v12, %v579_v12  ;;  %v838_v16 = vsel %vm164_vm3, %v801_v13, 0.0  ;;  %v873_v17 = vmul.f32 %v801_v13, %v801_v13  ;;  %v136_v18 = vpop.f32.mrf.mxu0  ;;  %v359_v19 = vpop.f32.mrf.mxu1 }
  0xb3   :  { %v617_v20 = vadd.f32 %v616_v14, %v615_v60  ;;  %v839_v21 = vadd.f32 %v838_v16, %v837_v61  ;;  %v208_v38 = vmul.f32 %v136_v18, %v136_v18  ;;  %v174_v43 = vsel %vm164_vm3, %v136_v18, 0.0 }
  0xb4   :  { %v670_v22 = vsel %vm164_vm3, %v651_v15, 0.0  ;;  %v892_v23 = vsel %vm164_vm3, %v873_v17, 0.0  ;;  %v396_v44 = vsel %vm164_vm3, %v359_v19, 0.0  ;;  %v430_v45 = vmul.f32 %v359_v19, %v359_v19 }
  0xb5   :  { %v671_v24 = vadd.f32 %v670_v22, %v669_v4  ;;  %v893_v25 = vadd.f32 %v892_v23, %v891_v5  ;;  %v228_v46 = vsel %vm164_vm3, %v208_v38, 0.0  ;;  %v175_v51 = vadd.f32 %v174_v43, %v173_v2 }
  0xb6   :  { %v397_v52 = vadd.f32 %v396_v44, %v395_v7  ;;  %v229_v53 = vadd.f32 %v228_v46, %v227_v8  ;;  %v450_v54 = vsel %vm164_vm3, %v430_v45, 0.0 }
  0xb7   :  { %v451_v3 = vadd.f32 %v450_v54, %v449_v11 }
  0xb9   :  { %v581_v26 = vpop.f32.mrf.mxu2  ;;  %v803_v27 = vpop.f32.mrf.mxu3 }
  0xba   :  { %v139_v28 = vpop.f32.mrf.mxu0  ;;  %v362_v29 = vpop.f32.mrf.mxu1  ;;  %v652_v47 = vmul.f32 %v581_v26, %v581_v26  ;;  %v874_v48 = vmul.f32 %v803_v27, %v803_v27  ;;  %v618_v55 = vsel %vm164_vm3, %v581_v26, 0.0  ;;  %v840_v56 = vsel %vm164_vm3, %v803_v27, 0.0 }
  0xbb   :  { %v209_v49 = vmul.f32 %v139_v28, %v139_v28  ;;  %v431_v50 = vmul.f32 %v362_v29, %v362_v29  ;;  %v176_v59 = vsel %vm164_vm3, %v139_v28, 0.0  ;;  %v398_v60 = vsel %vm164_vm3, %v362_v29, 0.0 }
  0xbc   :  { %v672_v57 = vsel %vm164_vm3, %v652_v47, 0.0  ;;  %v894_v58 = vsel %vm164_vm3, %v874_v48, 0.0  ;;  %v619_v4 = vadd.f32 %v618_v55, %v617_v20  ;;  %v841_v10 = vadd.f32 %v840_v56, %v839_v21 }
  0xbd   :  { %v230_v61 = vsel %vm164_vm3, %v209_v49, 0.0  ;;  %v452_v62 = vsel %vm164_vm3, %v431_v50, 0.0  ;;  %v673_v9 = vadd.f32 %v672_v57, %v671_v24  ;;  %v895_v12 = vadd.f32 %v894_v58, %v893_v25 }
  0xbe   :  { %v177_v13 = vadd.f32 %v176_v59, %v175_v51  ;;  %v231_v14 = vadd.f32 %v230_v61, %v229_v53  ;;  %v399_v15 = vadd.f32 %v398_v60, %v397_v52  ;;  %v453_v16 = vadd.f32 %v452_v62, %v451_v3 }
  0xc1   :  { %v584_v30 = vpop.f32.mrf.mxu2  ;;  %v806_v31 = vpop.f32.mrf.mxu3 }
  0xc2   :  { %v141_v32 = vpop.f32.mrf.mxu0  ;;  %v364_v33 = vpop.f32.mrf.mxu1  ;;  %v653_v63 = vmul.f32 %v584_v30, %v584_v30  ;;  %v875_v0 = vmul.f32 %v806_v31, %v806_v31  ;;  %v620_v17 = vsel %vm164_vm3, %v584_v30, 0.0  ;;  %v842_v11 = vsel %vm164_vm3, %v806_v31, 0.0 }
  0xc3   :  { %v210_v5 = vmul.f32 %v141_v32, %v141_v32  ;;  %v432_v6 = vmul.f32 %v364_v33, %v364_v33  ;;  %v178_v20 = vsel %vm164_vm3, %v141_v32, 0.0  ;;  %v400_v23 = vsel %vm164_vm3, %v364_v33, 0.0 }
  0xc4   :  { %v674_v18 = vsel %vm164_vm3, %v653_v63, 0.0  ;;  %v896_v19 = vsel %vm164_vm3, %v875_v0, 0.0  ;;  %v621_v25 = vadd.f32 %v620_v17, %v619_v4  ;;  %v843_v30 = vadd.f32 %v842_v11, %v841_v10 }
  0xc5   :  { %v232_v22 = vsel %vm164_vm3, %v210_v5, 0.0  ;;  %v454_v21 = vsel %vm164_vm3, %v432_v6, 0.0  ;;  %v675_v29 = vadd.f32 %v674_v18, %v673_v9  ;;  %v179_v31 = vadd.f32 %v178_v20, %v177_v13 }
  0xc6   :  { %v897_v38 = vadd.f32 %v896_v19, %v895_v12  ;;  %v233_v33 = vadd.f32 %v232_v22, %v231_v14  ;;  %v401_v43 = vadd.f32 %v400_v23, %v399_v15  ;;  %v455_v44 = vadd.f32 %v454_v21, %v453_v16 }
  0xc9   :  { %v586_v34 = vpop.f32.mrf.mxu2  ;;  %v1375_v35 = vpop.f32.mrf.mxu3 }
  0xca   :  { %v1377_v36 = vpop.f32.mrf.mxu0  ;;  %v1379_v37 = vpop.f32.mrf.mxu1  ;;  %v654_v24 = vmul.f32 %v586_v34, %v586_v34  ;;  %v622_v26 = vsel %vm164_vm3, %v586_v34, 0.0  ;;  %v876_v27 = vmul.f32 %v1375_v35, %v1375_v35  ;;  %v844_v48 = vsel %vm164_vm3, %v1375_v35, 0.0 }
  0xcb   :  { %v211_v28 = vmul.f32 %v1377_v36, %v1377_v36  ;;  %v433_v32 = vmul.f32 %v1379_v37, %v1379_v37  ;;  %v623_v34 = vadd.f32 %v622_v26, %v621_v25  ;;  %v180_v49 = vsel %vm164_vm3, %v1377_v36, 0.0 }
  0xcc   :  { %v676_v47 = vsel %vm164_vm3, %v654_v24, 0.0  ;;  %v898_v52 = vsel %vm164_vm3, %v876_v27, 0.0  ;;  %v402_v54 = vsel %vm164_vm3, %v1379_v37, 0.0  ;;  %v845_v59 = vadd.f32 %v844_v48, %v843_v30 }
  0xcd   :  { %v234_v53 = vsel %vm164_vm3, %v211_v28, 0.0  ;;  %v456_v56 = vsel %vm164_vm3, %v433_v32, 0.0  ;;  %v677_v58 = vadd.f32 %v676_v47, %v675_v29  ;;  %v181_v60 = vadd.f32 %v180_v49, %v179_v31 }
  0xce   :  { %v899_v61 = vadd.f32 %v898_v52, %v897_v38  ;;  %v235_v62 = vadd.f32 %v234_v53, %v233_v33  ;;  %v403_v63 = vadd.f32 %v402_v54, %v401_v43  ;;  %v457_v3 = vadd.f32 %v456_v56, %v455_v44 }
  0xd1   :  { %v1381_v39 = vpop.f32.mrf.mxu2  ;;  %v1383_v40 = vpop.f32.mrf.mxu3 }
  0xd2   :  { %v1385_v41 = vpop.f32.mrf.mxu0  ;;  %v1387_v42 = vpop.f32.mrf.mxu1  ;;  %v655_v55 = vmul.f32 %v1381_v39, %v1381_v39  ;;  %v624_v35 = vsel %vm164_vm3, %v1381_v39, 0.0  ;;  %v877_v36 = vmul.f32 %v1383_v40, %v1383_v40  ;;  %v846_v0 = vsel %vm164_vm3, %v1383_v40, 0.0 }
  0xd3   :  { %v212_v57 = vmul.f32 %v1385_v41, %v1385_v41  ;;  %v434_v37 = vmul.f32 %v1387_v42, %v1387_v42  ;;  %v625_v39 = vadd.f32 %v624_v35, %v623_v34  ;;  %v182_v5 = vsel %vm164_vm3, %v1385_v41, 0.0 }
  0xd4   :  { %v678_v4 = vsel %vm164_vm3, %v655_v55, 0.0  ;;  %v900_v6 = vsel %vm164_vm3, %v877_v36, 0.0  ;;  %v404_v10 = vsel %vm164_vm3, %v1387_v42, 0.0  ;;  %v847_v13 = vadd.f32 %v846_v0, %v845_v59 }
  0xd5   :  { %v236_v9 = vsel %vm164_vm3, %v212_v57, 0.0  ;;  %v458_v40 = vsel %vm164_vm3, %v434_v37, 0.0  ;;  %v183_v17 = vadd.f32 %v182_v5, %v181_v60  ;;  %v679_v22 = vadd.f32 %v678_v4, %v677_v58 }
  0xd6   :  { %v901_v23 = vadd.f32 %v900_v6, %v899_v61  ;;  %v405_v21 = vadd.f32 %v404_v10, %v403_v63  ;;  %v459_v24 = vadd.f32 %v458_v40, %v457_v3 }
  0xd9   :  { %v1401_v1 = vpop.f32.mrf.mxu2  ;;  %v1403_v2 = vpop.f32.mrf.mxu3 }
  0xda   :  { %v1405_v7 = vpop.f32.mrf.mxu0  ;;  %v1407_v8 = vpop.f32.mrf.mxu1  ;;  %v656_v12 = vmul.f32 %v1401_v1, %v1401_v1  ;;  %v626_v14 = vsel %vm164_vm3, %v1401_v1, 0.0  ;;  %v878_v15 = vmul.f32 %v1403_v2, %v1403_v2  ;;  %v848_v18 = vsel %vm164_vm3, %v1403_v2, 0.0 }
  0xdb   :  { %v213_v42 = vmul.f32 %v1405_v7, %v1405_v7  ;;  %v435_v11 = vmul.f32 %v1407_v8, %v1407_v8  ;;  %v237_v1 = vadd.f32 %v236_v9, %v235_v62  ;;  %v627_v25 = vadd.f32 %v626_v14, %v625_v39 }
  0xdc   :  { %v680_v26 = vsel %vm164_vm3, %v656_v12, 0.0  ;;  %v184_v27 = vsel %vm164_vm3, %v1405_v7, 0.0  ;;  %v849_v2 = vadd.f32 %v848_v18, %v847_v13  ;;  %v902_v28 = vsel %vm164_vm3, %v878_v15, 0.0 }
  0xdd   :  { %v406_v29 = vsel %vm164_vm3, %v1407_v8, 0.0  ;;  %v238_v31 = vsel %vm164_vm3, %v213_v42, 0.0  ;;  %v460_v32 = vsel %vm164_vm3, %v435_v11, 0.0  ;;  %v681_v43 = vadd.f32 %v680_v26, %v679_v22 }
  0xde   :  { %v185_v44 = vadd.f32 %v184_v27, %v183_v17  ;;  %v903_v47 = vadd.f32 %v902_v28, %v901_v23  ;;  %v407_v48 = vadd.f32 %v406_v29, %v405_v21  ;;  %v239_v52 = vadd.f32 %v238_v31, %v237_v1 }
  0xdf   :  { %v461_v53 = vadd.f32 %v460_v32, %v459_v24 }
  0xe1   :  { %v594_v45 = vpop.f32.mrf.mxu2  ;;  %v1424_v46 = vpop.f32.mrf.mxu3 }
  0xe2   :  { %v151_v50 = vpop.f32.mrf.mxu0  ;;  %v1431_v51 = vpop.f32.mrf.mxu1  ;;  %v657_v30 = vmul.f32 %v594_v45, %v594_v45  ;;  %v628_v38 = vsel %vm164_vm3, %v594_v45, 0.0  ;;  %v879_v33 = vmul.f32 %v1424_v46, %v1424_v46  ;;  %v850_v8 = vsel %vm164_vm3, %v1424_v46, 0.0 }
  0xe3   :  { %v214_v34 = vmul.f32 %v151_v50, %v151_v50  ;;  %v436_v7 = vmul.f32 %v1431_v51, %v1431_v51  ;;  %v186_v49 = vsel %vm164_vm3, %v151_v50, 0.0  ;;  %v629_v54 = vadd.f32 %v628_v38, %v627_v25 }
  0xe4   :  { %v682_v45 = vsel %vm164_vm3, %v657_v30, 0.0  ;;  %v904_v35 = vsel %vm164_vm3, %v879_v33, 0.0  ;;  %v408_v36 = vsel %vm164_vm3, %v1431_v51, 0.0  ;;  %v851_v37 = vadd.f32 %v850_v8, %v849_v2 }
  0xe5   :  { %v187_v46 = vadd.f32 %v186_v49, %v185_v44  ;;  %v240_v50 = vsel %vm164_vm3, %v214_v34, 0.0  ;;  %v462_v61 = vsel %vm164_vm3, %v436_v7, 0.0  ;;  %v683_v39 = vadd.f32 %v682_v45, %v681_v43 }
  0xe6   :  { %v905_v4 = vadd.f32 %v904_v35, %v903_v47  ;;  %v409_v5 = vadd.f32 %v408_v36, %v407_v48  ;;  %v241_v6 = vadd.f32 %v240_v50, %v239_v52  ;;  %v463_v9 = vadd.f32 %v462_v61, %v461_v53 }
  0xe9   :  { %v596_v41 = vpop.f32.mrf.mxu2  ;;  %v818_v16 = vpop.f32.mrf.mxu3 }
  0xea   :  { %v154_v19 = vpop.f32.mrf.mxu0  ;;  %v377_v20 = vpop.f32.mrf.mxu1  ;;  %v658_v57 = vmul.f32 %v596_v41, %v596_v41  ;;  %v880_v58 = vmul.f32 %v818_v16, %v818_v16  ;;  %v630_v62 = vsel %vm164_vm3, %v596_v41, 0.0  ;;  %v852_v63 = vsel %vm164_vm3, %v818_v16, 0.0 }
  0xeb   :  { %v215_v0 = vmul.f32 %v154_v19, %v154_v19  ;;  %v437_v3 = vmul.f32 %v377_v20, %v377_v20  ;;  %v188_v51 = vsel %vm164_vm3, %v154_v19, 0.0  ;;  %v631_v13 = vadd.f32 %v630_v62, %v629_v54 }
  0xec   :  { %v684_v10 = vsel %vm164_vm3, %v658_v57, 0.0  ;;  %v906_v12 = vsel %vm164_vm3, %v880_v58, 0.0  ;;  %v853_v40 = vadd.f32 %v852_v63, %v851_v37  ;;  %v410_v14 = vsel %vm164_vm3, %v377_v20, 0.0 }
  0xed   :  { %v189_v41 = vadd.f32 %v188_v51, %v187_v46  ;;  %v242_v16 = vsel %vm164_vm3, %v215_v0, 0.0  ;;  %v464_v17 = vsel %vm164_vm3, %v437_v3, 0.0  ;;  %v685_v42 = vadd.f32 %v684_v10, %v683_v39 }
  0xee   :  { %v907_v11 = vadd.f32 %v906_v12, %v905_v4  ;;  %v411_v21 = vadd.f32 %v410_v14, %v409_v5  ;;  %v243_v2 = vadd.f32 %v242_v16, %v241_v6  ;;  %v465_v28 = vadd.f32 %v464_v17, %v463_v9 }
  0xf1   :  { %v599_v55 = vpop.f32.mrf.mxu2  ;;  %v821_v56 = vpop.f32.mrf.mxu3 }
  0xf2   :  { %v156_v59 = vpop.f32.mrf.mxu0  ;;  %v379_v60 = vpop.f32.mrf.mxu1  ;;  %v659_v15 = vmul.f32 %v599_v55, %v599_v55  ;;  %v881_v18 = vmul.f32 %v821_v56, %v821_v56  ;;  %v632_v19 = vsel %vm164_vm3, %v599_v55, 0.0  ;;  %v854_v24 = vsel %vm164_vm3, %v821_v56, 0.0 }
  0xf3   :  { %v216_v22 = vmul.f32 %v156_v59, %v156_v59  ;;  %v190_v25 = vsel %vm164_vm3, %v156_v59, 0.0  ;;  %v438_v20 = vmul.f32 %v379_v60, %v379_v60  ;;  %v633_v31 = vadd.f32 %v632_v19, %v631_v13 }
  0xf4   :  { %v686_v29 = vsel %vm164_vm3, %v659_v15, 0.0  ;;  %v908_v32 = vsel %vm164_vm3, %v881_v18, 0.0  ;;  %v412_v38 = vsel %vm164_vm3, %v379_v60, 0.0  ;;  %v855_v43 = vadd.f32 %v854_v24, %v853_v40 }
  0xf5   :  { %v191_v44 = vadd.f32 %v190_v25, %v189_v41  ;;  %v244_v34 = vsel %vm164_vm3, %v216_v22, 0.0  ;;  %v687_v47 = vadd.f32 %v686_v29, %v685_v42  ;;  %v466_v48 = vsel %vm164_vm3, %v438_v20, 0.0 }
  0xf6   :  { %v909_v52 = vadd.f32 %v908_v32, %v907_v11  ;;  %v413_v53 = vadd.f32 %v412_v38, %v411_v21  ;;  %v245_v55 = vadd.f32 %v244_v34, %v243_v2  ;;  %v467_v57 = vadd.f32 %v466_v48, %v465_v28 }
  0xf9   :  { %v601_v23 = vpop.f32.mrf.mxu2  ;;  %v823_v1 = vpop.f32.mrf.mxu3 }
  0xfa   :  { %v159_v26 = vpop.f32.mrf.mxu0  ;;  %v382_v27 = vpop.f32.mrf.mxu1  ;;  %v660_v30 = vmul.f32 %v601_v23, %v601_v23  ;;  %v882_v7 = vmul.f32 %v823_v1, %v823_v1  ;;  %v634_v8 = vsel %vm164_vm3, %v601_v23, 0.0  ;;  %v856_v49 = vsel %vm164_vm3, %v823_v1, 0.0 }
  0xfb   :  { %v217_v33 = vmul.f32 %v159_v26, %v159_v26  ;;  %v192_v45 = vsel %vm164_vm3, %v159_v26, 0.0  ;;  %v414_v35 = vsel %vm164_vm3, %v382_v27, 0.0  ;;  %v439_v36 = vmul.f32 %v382_v27, %v382_v27 }
  0xfc   :  { %v688_v54 = vsel %vm164_vm3, %v660_v30, 0.0  ;;  %v635_v58 = vadd.f32 %v634_v8, %v633_v31  ;;  %v857_v59 = vadd.f32 %v856_v49, %v855_v43  ;;  %v910_v60 = vsel %vm164_vm3, %v882_v7, 0.0 }
  0xfd   :  { %v246_v56 = vsel %vm164_vm3, %v217_v33, 0.0  ;;  %v689_v50 = vadd.f32 %v688_v54, %v687_v47  ;;  %v193_v61 = vadd.f32 %v192_v45, %v191_v44  ;;  %v415_v4 = vadd.f32 %v414_v35, %v413_v53 }
  0xfe   :  { %v247_v39 = vadd.f32 %v246_v56, %v245_v55  ;;  %v468_v6 = vsel %vm164_vm3, %v439_v36, 0.0  ;;  %v911_v42 = vadd.f32 %v910_v60, %v909_v52 }
  0xff   :  { %v469_v11 = vadd.f32 %v468_v6, %v467_v57 }
 0x101   :  { %v604_v37 = vpop.f32.mrf.mxu2  ;;  %v826_v46 = vpop.f32.mrf.mxu3 }
 0x102   :  { %v661_v62 = vmul.f32 %v604_v37, %v604_v37  ;;  %v883_v63 = vmul.f32 %v826_v46, %v826_v46  ;;  %v161_v0 = vpop.f32.mrf.mxu0  ;;  %v384_v3 = vpop.f32.mrf.mxu1  ;;  %v636_v9 = vsel %vm164_vm3, %v604_v37, 0.0  ;;  %v858_v40 = vsel %vm164_vm3, %v826_v46, 0.0 }
 0x103   :  { %v194_v5 = vsel %vm164_vm3, %v161_v0, 0.0  ;;  %v218_v51 = vmul.f32 %v161_v0, %v161_v0  ;;  %v416_v12 = vsel %vm164_vm3, %v384_v3, 0.0  ;;  %v440_v18 = vmul.f32 %v384_v3, %v384_v3 }
 0x104   :  { %v195_v10 = vadd.f32 %v194_v5, %v193_v61  ;;  %v690_v13 = vsel %vm164_vm3, %v661_v62, 0.0  ;;  %v417_v15 = vadd.f32 %v416_v12, %v415_v4  ;;  %v912_v41 = vsel %vm164_vm3, %v883_v63, 0.0 }
 0x105   :  { %v248_v14 = vsel %vm164_vm3, %v218_v51, 0.0  ;;  %v637_v19 = vadd.f32 %v636_v9, %v635_v58  ;;  %v859_v23 = vadd.f32 %v858_v40, %v857_v59  ;;  %v470_v24 = vsel %vm164_vm3, %v440_v18, 0.0 }
 0x106   :  { %v196_v16 = vrot.slane %v195_v10, 4  ;;  %v249_v17 = vadd.f32 %v248_v14, %v247_v39  ;;  %v418_v22 = vrot.slane %v417_v15, 4  ;;  %v691_v25 = vadd.f32 %v690_v13, %v689_v50 }
 0x107   :  { %v913_v20 = vadd.f32 %v912_v41, %v911_v42  ;;  %v471_v27 = vadd.f32 %v470_v24, %v469_v11 }
 0x108   :  { %v197_v1 = vadd.f32 %v196_v16, %v195_v10  ;;  %v250_v21 = vrot.slane %v249_v17, 4  ;;  %v419_v26 = vadd.f32 %v418_v22, %v417_v15 }
 0x109   :  { %v606_v2 = vpop.f32.mrf.mxu2  ;;  %v828_v28 = vpop.f32.mrf.mxu3  ;;  %v472_v33 = vrot.slane %v471_v27, 4 }
 0x10a   :  { %v198_v29 = vrot.slane %v197_v1, 2  ;;  %v251_v30 = vadd.f32 %v250_v21, %v249_v17  ;;  %v638_v31 = vsel %vm164_vm3, %v606_v2, 0.0  ;;  %v662_v32 = vmul.f32 %v606_v2, %v606_v2 }
 0x10b   :  { %v420_v38 = vrot.slane %v419_v26, 2  ;;  %v639_v43 = vadd.f32 %v638_v31, %v637_v19  ;;  %v860_v44 = vsel %vm164_vm3, %v828_v28, 0.0  ;;  %v473_v49 = vadd.f32 %v472_v33, %v471_v27 }
 0x10c   :  { %v199_v34 = vadd.f32 %v198_v29, %v197_v1  ;;  %v252_v7 = vrot.slane %v251_v30, 2  ;;  %v692_v47 = vsel %vm164_vm3, %v662_v32, 0.0  ;;  %v861_v48 = vadd.f32 %v860_v44, %v859_v23 }
 0x10d   :  { %v421_v8 = vadd.f32 %v420_v38, %v419_v26  ;;  %v640_v52 = vrot.slane %v639_v43, 4  ;;  %v693_v53 = vadd.f32 %v692_v47, %v691_v25  ;;  %v884_v56 = vmul.f32 %v828_v28, %v828_v28 }
 0x10e   :  { %v200_v54 = vrot.slane %v199_v34, 1  ;;  %v253_v45 = vadd.f32 %v252_v7, %v251_v30  ;;  %v862_v55 = vrot.slane %v861_v48, 4  ;;  %v474_v36 = vrot.slane %v473_v49, 2 }
 0x10f   :  { %v422_v35 = vrot.slane %v421_v8, 1  ;;  %v641_v57 = vadd.f32 %v640_v52, %v639_v43  ;;  %v694_v58 = vrot.slane %v693_v53, 4  ;;  %v914_v46 = vsel %vm164_vm3, %v884_v56, 0.0 }
 0x110   :  { %v201_v59 = vadd.f32 %v200_v54, %v199_v34  ;;  %v254_v60 = vrot.slane %v253_v45, 1  ;;  %v863_v37 = vadd.f32 %v862_v55, %v861_v48  ;;  %v475_v61 = vadd.f32 %v474_v36, %v473_v49 }
 0x111   :  { %v423_v50 = vadd.f32 %v422_v35, %v421_v8  ;;  %v642_v62 = vrot.slane %v641_v57, 2  ;;  %v695_v63 = vadd.f32 %v694_v58, %v693_v53  ;;  %v915_v39 = vadd.f32 %v914_v46, %v913_v20 }
 0x112   :  { %v255_v0 = vadd.f32 %v254_v60, %v253_v45  ;;  %v864_v3 = vrot.slane %v863_v37, 2  ;;  %v476_v5 = vrot.slane %v475_v61, 1 }
 0x113   :  { %v424_v4 = vadd.f32 %v423_v50, %v201_v59  ;;  %v643_v51 = vadd.f32 %v642_v62, %v641_v57  ;;  %v696_v6 = vrot.slane %v695_v63, 2  ;;  %v916_v10 = vrot.slane %v915_v39, 4 }
 0x114   :  { %v865_v9 = vadd.f32 %v864_v3, %v863_v37  ;;  %v477_v12 = vadd.f32 %v476_v5, %v475_v61 }
 0x115   :  { %v644_v13 = vrot.slane %v643_v51, 1  ;;  %v697_v40 = vadd.f32 %v696_v6, %v695_v63  ;;  %v917_v15 = vadd.f32 %v916_v10, %v915_v39 }
 0x116   :  { %v866_v14 = vrot.slane %v865_v9, 1  ;;  %v478_v41 = vadd.f32 %v477_v12, %v255_v0 }
 0x117   :  { %v645_v16 = vadd.f32 %v644_v13, %v643_v51  ;;  %v698_v17 = vrot.slane %v697_v40, 1  ;;  %v918_v18 = vrot.slane %v917_v15, 2 }
 0x118   :  { %v867_v19 = vadd.f32 %v866_v14, %v865_v9 }
 0x119   :  { %v646_v42 = vadd.f32 %v645_v16, %v424_v4  ;;  %v699_v11 = vadd.f32 %v698_v17, %v697_v40  ;;  %v919_v22 = vadd.f32 %v918_v18, %v917_v15 }
 0x11b   :  { %v700_v23 = vadd.f32 %v699_v11, %v478_v41  ;;  %v868_v1 = vadd.f32 %v867_v19, %v646_v42  ;;  %v920_v21 = vrot.slane %v919_v22, 1 }
 0x11d   :  { %v921_v24 = vadd.f32 %v920_v21, %v919_v22 }
 0x11f   :  { %v922_v25 = vadd.f32 %v921_v24, %v700_v23 }
 0x121   :  { %v924_v20 = vsel %vm923_vm4, %v868_v1, %v922_v25 }
 0x122   :  { %926 = vst.msk [vmem:[%s1533_s2] sm:$0x3] %vm925_vm5, %v924_v20 }

// kernel: generalized_convnet2.3
= control target key start
LH: loop header
LB: loop body
LE: loop exit
PB: predicated region body
PF: predicated region fallthrough
CT: control target
= control target key end

     0   :  { %vm116_vm0 = vcmask 1044480   ;;  %vm117_vm1 = vcmask 1045504   ;;  %v1156_v2 = vmov 65535   ;;  %vm91_vm2 = vcmask 220160   ;;  %s1521_s1 = inlined_call_operand.vmem [shape: bf16[27,64], index: 1, kind: input, shape index: {}]   ;;  %s1522_s2 = inlined_call_operand.vmem [shape: f32[1,64], index: 2, kind: input, shape index: {}]   ;;  %s1523_s3 = inlined_call_operand.vmem [shape: f32[1,64], index: 3, kind: input, shape index: {}]   ;;  %s1524_s0 = inlined_call_operand.vmem [shape: bf16[4,128,27], index: 0, kind: input, shape index: {}]   ;;  %s1525_s4 = inlined_call_operand.vmem [shape: f32[2,64,64], index: 4, kind: output, shape index: {}]  }
   0x1   :  { %v932_v0 = vld [vmem:[%s1521_s1 + $0x8] sm:$0xf]  ;;  %v1119_v1 = vld [vmem:[%s1521_s1 + $0x8] sm:$0x30]  ;;  %v118_v3 = vsel %vm116_vm0, 4294967295, %v1156_v2  ;;  %v1118_v7 = vld [vmem:[%s1521_s1] sm:$0xff] }
   0x2   :  { %v933_v4 = vor.u32 %v1119_v1, %v932_v0  ;;  %v119_v5 = vsel %vm117_vm1, %v118_v3, 0  ;;  %v1120_v8 = vld [vmem:[%s1524_s0] sm:$0xff]  ;;  %v1121_v12 = vld [vmem:[%s1524_s0 + $0x8] sm:$0xff]  ;;  %v1122_v16 = vld [vmem:[%s1524_s0 + $0x10] sm:$0xff]  ;;  %vm840_vm3 = vcmask 523264  }
   0x3   :  { %v1128_v9 = vld [vmem:[%s1524_s0 + $0x40] sm:$0xff]  ;;  %v1129_v13 = vld [vmem:[%s1524_s0 + $0x48] sm:$0xff]  ;;  %v1130_v17 = vld [vmem:[%s1524_s0 + $0x50] sm:$0xff] }
   0x4   :  { %v121_v6 = vand.u32 %v933_v4, %v119_v5  ;;  %v1136_v10 = vld [vmem:[%s1524_s0 + $0x80] sm:$0xff]  ;;  %v1137_v14 = vld [vmem:[%s1524_s0 + $0x88] sm:$0xff]  ;;  %v1138_v18 = vld [vmem:[%s1524_s0 + $0x90] sm:$0xff] }
   0x5   :  { %v1144_v11 = vld [vmem:[%s1524_s0 + $0xc0] sm:$0xff]  ;;  %v1145_v15 = vld [vmem:[%s1524_s0 + $0xc8] sm:$0xff]  ;;  %v1146_v19 = vld [vmem:[%s1524_s0 + $0xd0] sm:$0xff] }
   0x6   :  { %129 = vmatpush.bf16.msra.mxu0 %v121_v6  ;;  %313 = vmatpush.bf16.msra.mxu1 %v121_v6  ;;  %v1123_v20 = vld [vmem:[%s1524_s0 + $0x18] sm:$0xff]  ;;  %v1124_v24 = vld [vmem:[%s1524_s0 + $0x20] sm:$0xff]  ;;  %v1125_v28 = vld [vmem:[%s1524_s0 + $0x28] sm:$0xff] }
   0x7   :  { %507 = vmatpush.bf16.msra.mxu2 %v121_v6  ;;  %701 = vmatpush.bf16.msra.mxu3 %v121_v6  ;;  %v1131_v21 = vld [vmem:[%s1524_s0 + $0x58] sm:$0xff]  ;;  %v1132_v25 = vld [vmem:[%s1524_s0 + $0x60] sm:$0xff]  ;;  %v1133_v29 = vld [vmem:[%s1524_s0 + $0x68] sm:$0xff] }
   0x8   :  { %v1139_v22 = vld [vmem:[%s1524_s0 + $0x98] sm:$0xff]  ;;  %v1140_v26 = vld [vmem:[%s1524_s0 + $0xa0] sm:$0xff]  ;;  %v1141_v30 = vld [vmem:[%s1524_s0 + $0xa8] sm:$0xff] }
   0x9   :  { %v1147_v23 = vld [vmem:[%s1524_s0 + $0xd8] sm:$0xff]  ;;  %v1148_v27 = vld [vmem:[%s1524_s0 + $0xe0] sm:$0xff]  ;;  %v1149_v31 = vld [vmem:[%s1524_s0 + $0xe8] sm:$0xff] }
   0xa   :  { %130 = vmatpush.bf16.msra.mxu0 %v1118_v7  ;;  %314 = vmatpush.bf16.msra.mxu1 %v1118_v7  ;;  %v1126_v32 = vld [vmem:[%s1524_s0 + $0x30] sm:$0xff]  ;;  %v1127_v36 = vld [vmem:[%s1524_s0 + $0x38] sm:$0xff]  ;;  %v1322_v40 = vld [vmem:[%s1522_s2] ss:$0 sm:$0xff] }
   0xb   :  { %508 = vmatpush.bf16.msra.mxu2 %v1118_v7  ;;  %702 = vmatpush.bf16.msra.mxu3 %v1118_v7  ;;  %v1134_v33 = vld [vmem:[%s1524_s0 + $0x70] sm:$0xff]  ;;  %v1135_v37 = vld [vmem:[%s1524_s0 + $0x78] sm:$0xff]  ;;  %v1327_v41 = vld [vmem:[%s1523_s3] ss:$0 sm:$0xff] }
   0xc   :  { %v1142_v34 = vld [vmem:[%s1524_s0 + $0xb0] sm:$0xff]  ;;  %v1143_v38 = vld [vmem:[%s1524_s0 + $0xb8] sm:$0xff] }
   0xd   :  { %934 = vmatmul.msk.bf16.vlgmr.msra.gmra.mxu0 %vm91_vm2, %v1120_v8  ;;  %990 = vmatmul.msk.bf16.vlgmr.msra.gmra.mxu1 %vm91_vm2, %v1128_v9  ;;  %v1150_v35 = vld [vmem:[%s1524_s0 + $0xf0] sm:$0xff]  ;;  %v1151_v39 = vld [vmem:[%s1524_s0 + $0xf8] sm:$0xff] }
   0xe   :  { %1046 = vmatmul.msk.bf16.vlgmr.msra.gmra.mxu2 %vm91_vm2, %v1136_v10  ;;  %1102 = vmatmul.msk.bf16.vlgmr.msra.gmra.mxu3 %vm91_vm2, %v1144_v11 }
  0x1d   :  { %935 = vmatmul.msk.bf16.gmra.mxu0 %vm91_vm2, %v1121_v12  ;;  %991 = vmatmul.msk.bf16.gmra.mxu1 %vm91_vm2, %v1129_v13 }
  0x1e   :  { %1047 = vmatmul.msk.bf16.gmra.mxu2 %vm91_vm2, %v1137_v14  ;;  %1103 = vmatmul.msk.bf16.gmra.mxu3 %vm91_vm2, %v1145_v15 }
  0x2d   :  { %936 = vmatmul.msk.bf16.gmra.mxu0 %vm91_vm2, %v1122_v16  ;;  %992 = vmatmul.msk.bf16.gmra.mxu1 %vm91_vm2, %v1130_v17 }
  0x2e   :  { %1048 = vmatmul.msk.bf16.gmra.mxu2 %vm91_vm2, %v1138_v18  ;;  %1104 = vmatmul.msk.bf16.gmra.mxu3 %vm91_vm2, %v1146_v19 }
  0x3d   :  { %937 = vmatmul.msk.bf16.gmra.mxu0 %vm91_vm2, %v1123_v20  ;;  %993 = vmatmul.msk.bf16.gmra.mxu1 %vm91_vm2, %v1131_v21 }
  0x3e   :  { %1049 = vmatmul.msk.bf16.gmra.mxu2 %vm91_vm2, %v1139_v22  ;;  %1105 = vmatmul.msk.bf16.gmra.mxu3 %vm91_vm2, %v1147_v23 }
  0x4d   :  { %938 = vmatmul.msk.bf16.gmra.mxu0 %vm91_vm2, %v1124_v24  ;;  %994 = vmatmul.msk.bf16.gmra.mxu1 %vm91_vm2, %v1132_v25 }
  0x4e   :  { %1050 = vmatmul.msk.bf16.gmra.mxu2 %vm91_vm2, %v1140_v26  ;;  %1106 = vmatmul.msk.bf16.gmra.mxu3 %vm91_vm2, %v1148_v27 }
  0x5d   :  { %939 = vmatmul.msk.bf16.gmra.mxu0 %vm91_vm2, %v1125_v28  ;;  %995 = vmatmul.msk.bf16.gmra.mxu1 %vm91_vm2, %v1133_v29 }
  0x5e   :  { %1051 = vmatmul.msk.bf16.gmra.mxu2 %vm91_vm2, %v1141_v30  ;;  %1107 = vmatmul.msk.bf16.gmra.mxu3 %vm91_vm2, %v1149_v31 }
  0x6d   :  { %940 = vmatmul.msk.bf16.gmra.mxu0 %vm91_vm2, %v1126_v32  ;;  %996 = vmatmul.msk.bf16.gmra.mxu1 %vm91_vm2, %v1134_v33 }
  0x6e   :  { %1052 = vmatmul.msk.bf16.gmra.mxu2 %vm91_vm2, %v1142_v34  ;;  %1108 = vmatmul.msk.bf16.gmra.mxu3 %vm91_vm2, %v1150_v35 }
  0x7d   :  { %941 = vmatmul.msk.bf16.gmra.mxu0 %vm91_vm2, %v1127_v36  ;;  %997 = vmatmul.msk.bf16.gmra.mxu1 %vm91_vm2, %v1135_v37 }
  0x7e   :  { %1053 = vmatmul.msk.bf16.gmra.mxu2 %vm91_vm2, %v1143_v38  ;;  %1109 = vmatmul.msk.bf16.gmra.mxu3 %vm91_vm2, %v1151_v39 }
  0x8a   :  { %v132_v42 = vpop.f32.mrf.mxu0  ;;  %v316_v43 = vpop.f32.mrf.mxu1 }
  0x8b   :  { %v175_v44 = vmul.f32 %v1322_v40, %v132_v42  ;;  %v356_v45 = vmul.f32 %v1322_v40, %v316_v43 }
  0x8d   :  { %v194_v46 = vadd.f32 %v1327_v41, %v175_v44  ;;  %v372_v47 = vadd.f32 %v1327_v41, %v356_v45 }
  0x8f   :  { %v210_v48 = vmax.f32 %v194_v46, 0.0  ;;  %v388_v49 = vmax.f32 %v372_v47, 0.0 }
  0x91   :  { %v510_v50 = vpop.f32.mrf.mxu2  ;;  %v704_v51 = vpop.f32.mrf.mxu3  ;;  %v404_v59 = vmax.f32 %v210_v48, %v388_v49 }
  0x92   :  { %v550_v52 = vmul.f32 %v1322_v40, %v510_v50  ;;  %v744_v53 = vmul.f32 %v1322_v40, %v704_v51  ;;  %v134_v54 = vpop.f32.mrf.mxu0  ;;  %v318_v55 = vpop.f32.mrf.mxu1 }
  0x93   :  { %v176_v56 = vmul.f32 %v1322_v40, %v134_v54  ;;  %v357_v57 = vmul.f32 %v1322_v40, %v318_v55 }
  0x94   :  { %v566_v58 = vadd.f32 %v1327_v41, %v550_v52  ;;  %v760_v60 = vadd.f32 %v1327_v41, %v744_v53 }
  0x95   :  { %v195_v61 = vadd.f32 %v1327_v41, %v176_v56  ;;  %v373_v63 = vadd.f32 %v1327_v41, %v357_v57 }
  0x96   :  { %v582_v62 = vmax.f32 %v566_v58, 0.0  ;;  %v776_v0 = vmax.f32 %v760_v60, 0.0 }
  0x97   :  { %v211_v2 = vmax.f32 %v195_v61, 0.0  ;;  %v389_v5 = vmax.f32 %v373_v63, 0.0 }
  0x98   :  { %v598_v1 = vmax.f32 %v404_v59, %v582_v62 }
  0x99   :  { %v512_v3 = vpop.f32.mrf.mxu2  ;;  %v706_v4 = vpop.f32.mrf.mxu3  ;;  %v405_v17 = vmax.f32 %v211_v2, %v389_v5 }
  0x9a   :  { %v551_v6 = vmul.f32 %v1322_v40, %v512_v3  ;;  %v745_v7 = vmul.f32 %v1322_v40, %v706_v4  ;;  %v137_v8 = vpop.f32.mrf.mxu0  ;;  %v321_v9 = vpop.f32.mrf.mxu1  ;;  %v792_v10 = vmax.f32 %v598_v1, %v776_v0 }
  0x9b   :  { %v177_v11 = vmul.f32 %v1322_v40, %v137_v8  ;;  %v358_v12 = vmul.f32 %v1322_v40, %v321_v9 }
  0x9c   :  { %v567_v13 = vadd.f32 %v1327_v41, %v551_v6  ;;  %v761_v14 = vadd.f32 %v1327_v41, %v745_v7  ;;  %808 = vxpose.xlu0.b32.start [1/8] (short) (narrow) %v792_v10, 64 }
  0x9d   :  { %v196_v15 = vadd.f32 %v1327_v41, %v177_v11  ;;  %v374_v16 = vadd.f32 %v1327_v41, %v358_v12 }
  0x9e   :  { %v583_v18 = vmax.f32 %v567_v13, 0.0  ;;  %v777_v19 = vmax.f32 %v761_v14, 0.0 }
  0x9f   :  { %v212_v20 = vmax.f32 %v196_v15, 0.0  ;;  %v390_v21 = vmax.f32 %v374_v16, 0.0 }
  0xa0   :  { %v599_v22 = vmax.f32 %v405_v17, %v583_v18 }
  0xa1   :  { %v515_v23 = vpop.f32.mrf.mxu2  ;;  %v709_v24 = vpop.f32.mrf.mxu3  ;;  %v406_v32 = vmax.f32 %v212_v20, %v390_v21 }
  0xa2   :  { %v552_v25 = vmul.f32 %v1322_v40, %v515_v23  ;;  %v746_v26 = vmul.f32 %v1322_v40, %v709_v24  ;;  %v139_v27 = vpop.f32.mrf.mxu0  ;;  %v323_v28 = vpop.f32.mrf.mxu1  ;;  %v793_v29 = vmax.f32 %v599_v22, %v777_v19 }
  0xa3   :  { %v178_v30 = vmul.f32 %v1322_v40, %v139_v27  ;;  %v359_v31 = vmul.f32 %v1322_v40, %v323_v28 }
  0xa4   :  { %v568_v33 = vadd.f32 %v1327_v41, %v552_v25  ;;  %v762_v34 = vadd.f32 %v1327_v41, %v746_v26  ;;  %809 = vxpose.xlu0.b32.cont [2/8] (short) (narrow) %v793_v29, 64 }
  0xa5   :  { %v197_v35 = vadd.f32 %v1327_v41, %v178_v30  ;;  %v375_v38 = vadd.f32 %v1327_v41, %v359_v31 }
  0xa6   :  { %v584_v36 = vmax.f32 %v568_v33, 0.0  ;;  %v778_v37 = vmax.f32 %v762_v34, 0.0 }
  0xa7   :  { %v213_v42 = vmax.f32 %v197_v35, 0.0  ;;  %v391_v45 = vmax.f32 %v375_v38, 0.0 }
  0xa8   :  { %v600_v39 = vmax.f32 %v406_v32, %v584_v36 }
  0xa9   :  { %v517_v43 = vpop.f32.mrf.mxu2  ;;  %v711_v44 = vpop.f32.mrf.mxu3  ;;  %v407_v57 = vmax.f32 %v213_v42, %v391_v45 }
  0xaa   :  { %v553_v46 = vmul.f32 %v1322_v40, %v517_v43  ;;  %v747_v47 = vmul.f32 %v1322_v40, %v711_v44  ;;  %v142_v48 = vpop.f32.mrf.mxu0  ;;  %v326_v49 = vpop.f32.mrf.mxu1  ;;  %v794_v50 = vmax.f32 %v600_v39, %v778_v37 }
  0xab   :  { %v179_v51 = vmul.f32 %v1322_v40, %v142_v48  ;;  %v360_v52 = vmul.f32 %v1322_v40, %v326_v49 }
  0xac   :  { %v569_v53 = vadd.f32 %v1327_v41, %v553_v46  ;;  %v763_v54 = vadd.f32 %v1327_v41, %v747_v47  ;;  %810 = vxpose.xlu0.b32.cont [3/8] (short) (narrow) %v794_v50, 64 }
  0xad   :  { %v198_v55 = vadd.f32 %v1327_v41, %v179_v51  ;;  %v376_v56 = vadd.f32 %v1327_v41, %v360_v52 }
  0xae   :  { %v585_v58 = vmax.f32 %v569_v53, 0.0  ;;  %v779_v59 = vmax.f32 %v763_v54, 0.0 }
  0xaf   :  { %v214_v60 = vmax.f32 %v198_v55, 0.0  ;;  %v392_v61 = vmax.f32 %v376_v56, 0.0 }
  0xb0   :  { %v601_v62 = vmax.f32 %v407_v57, %v585_v58 }
  0xb1   :  { %v520_v63 = vpop.f32.mrf.mxu2  ;;  %v714_v0 = vpop.f32.mrf.mxu3  ;;  %v408_v8 = vmax.f32 %v214_v60, %v392_v61 }
  0xb2   :  { %v554_v1 = vmul.f32 %v1322_v40, %v520_v63  ;;  %v748_v2 = vmul.f32 %v1322_v40, %v714_v0  ;;  %v144_v3 = vpop.f32.mrf.mxu0  ;;  %v328_v4 = vpop.f32.mrf.mxu1  ;;  %v795_v5 = vmax.f32 %v601_v62, %v779_v59 }
  0xb3   :  { %v180_v6 = vmul.f32 %v1322_v40, %v144_v3  ;;  %v361_v7 = vmul.f32 %v1322_v40, %v328_v4 }
  0xb4   :  { %v570_v9 = vadd.f32 %v1327_v41, %v554_v1  ;;  %v764_v10 = vadd.f32 %v1327_v41, %v748_v2  ;;  %811 = vxpose.xlu0.b32.cont [4/8] (short) (narrow) %v795_v5, 64 }
  0xb5   :  { %v199_v11 = vadd.f32 %v1327_v41, %v180_v6  ;;  %v377_v14 = vadd.f32 %v1327_v41, %v361_v7 }
  0xb6   :  { %v586_v12 = vmax.f32 %v570_v9, 0.0  ;;  %v780_v13 = vmax.f32 %v764_v10, 0.0 }
  0xb7   :  { %v215_v16 = vmax.f32 %v199_v11, 0.0  ;;  %v393_v19 = vmax.f32 %v377_v14, 0.0 }
  0xb8   :  { %v602_v15 = vmax.f32 %v408_v8, %v586_v12 }
  0xb9   :  { %v522_v17 = vpop.f32.mrf.mxu2  ;;  %v716_v18 = vpop.f32.mrf.mxu3  ;;  %v409_v31 = vmax.f32 %v215_v16, %v393_v19 }
  0xba   :  { %v555_v20 = vmul.f32 %v1322_v40, %v522_v17  ;;  %v749_v21 = vmul.f32 %v1322_v40, %v716_v18  ;;  %v147_v22 = vpop.f32.mrf.mxu0  ;;  %v331_v23 = vpop.f32.mrf.mxu1  ;;  %v796_v24 = vmax.f32 %v602_v15, %v780_v13 }
  0xbb   :  { %v181_v25 = vmul.f32 %v1322_v40, %v147_v22  ;;  %v362_v26 = vmul.f32 %v1322_v40, %v331_v23 }
  0xbc   :  { %v571_v27 = vadd.f32 %v1327_v41, %v555_v20  ;;  %v765_v28 = vadd.f32 %v1327_v41, %v749_v21  ;;  %812 = vxpose.xlu0.b32.cont [5/8] (short) (narrow) %v796_v24, 64 }
  0xbd   :  { %v200_v29 = vadd.f32 %v1327_v41, %v181_v25  ;;  %v378_v30 = vadd.f32 %v1327_v41, %v362_v26 }
  0xbe   :  { %v587_v32 = vmax.f32 %v571_v27, 0.0  ;;  %v781_v33 = vmax.f32 %v765_v28, 0.0 }
  0xbf   :  { %v216_v34 = vmax.f32 %v200_v29, 0.0  ;;  %v394_v35 = vmax.f32 %v378_v30, 0.0 }
  0xc0   :  { %v603_v36 = vmax.f32 %v409_v31, %v587_v32 }
  0xc1   :  { %v525_v37 = vpop.f32.mrf.mxu2  ;;  %v719_v38 = vpop.f32.mrf.mxu3  ;;  %v410_v48 = vmax.f32 %v216_v34, %v394_v35 }
  0xc2   :  { %v556_v39 = vmul.f32 %v1322_v40, %v525_v37  ;;  %v750_v42 = vmul.f32 %v1322_v40, %v719_v38  ;;  %v149_v43 = vpop.f32.mrf.mxu0  ;;  %v333_v44 = vpop.f32.mrf.mxu1  ;;  %v797_v45 = vmax.f32 %v603_v36, %v781_v33 }
  0xc3   :  { %v182_v46 = vmul.f32 %v1322_v40, %v149_v43  ;;  %v363_v47 = vmul.f32 %v1322_v40, %v333_v44 }
  0xc4   :  { %v572_v49 = vadd.f32 %v1327_v41, %v556_v39  ;;  %v766_v50 = vadd.f32 %v1327_v41, %v750_v42  ;;  %813 = vxpose.xlu0.b32.cont [6/8] (short) (narrow) %v797_v45, 64 }
  0xc5   :  { %v201_v51 = vadd.f32 %v1327_v41, %v182_v46  ;;  %v379_v54 = vadd.f32 %v1327_v41, %v363_v47 }
  0xc6   :  { %v588_v52 = vmax.f32 %v572_v49, 0.0  ;;  %v782_v53 = vmax.f32 %v766_v50, 0.0 }
  0xc7   :  { %v217_v56 = vmax.f32 %v201_v51, 0.0  ;;  %v395_v59 = vmax.f32 %v379_v54, 0.0 }
  0xc8   :  { %v604_v55 = vmax.f32 %v410_v48, %v588_v52 }
  0xc9   :  { %v527_v57 = vpop.f32.mrf.mxu2  ;;  %v721_v58 = vpop.f32.mrf.mxu3  ;;  %v411_v7 = vmax.f32 %v217_v56, %v395_v59 }
  0xca   :  { %v557_v60 = vmul.f32 %v1322_v40, %v527_v57  ;;  %v751_v61 = vmul.f32 %v1322_v40, %v721_v58  ;;  %v152_v62 = vpop.f32.mrf.mxu0  ;;  %v336_v63 = vpop.f32.mrf.mxu1  ;;  %v798_v0 = vmax.f32 %v604_v55, %v782_v53 }
  0xcb   :  { %v183_v1 = vmul.f32 %v1322_v40, %v152_v62  ;;  %v364_v2 = vmul.f32 %v1322_v40, %v336_v63 }
  0xcc   :  { %v573_v3 = vadd.f32 %v1327_v41, %v557_v60  ;;  %v767_v4 = vadd.f32 %v1327_v41, %v751_v61  ;;  %814 = vxpose.xlu0.b32.cont [7/8] (short) (narrow) %v798_v0, 64 }
  0xcd   :  { %v202_v5 = vadd.f32 %v1327_v41, %v183_v1  ;;  %v380_v6 = vadd.f32 %v1327_v41, %v364_v2 }
  0xce   :  { %v589_v8 = vmax.f32 %v573_v3, 0.0  ;;  %v783_v9 = vmax.f32 %v767_v4, 0.0 }
  0xcf   :  { %v218_v10 = vmax.f32 %v202_v5, 0.0  ;;  %v396_v11 = vmax.f32 %v380_v6, 0.0 }
  0xd0   :  { %v605_v12 = vmax.f32 %v411_v7, %v589_v8 }
  0xd1   :  { %v530_v13 = vpop.f32.mrf.mxu2  ;;  %v724_v14 = vpop.f32.mrf.mxu3  ;;  %v412_v23 = vmax.f32 %v218_v10, %v396_v11 }
  0xd2   :  { %v558_v15 = vmul.f32 %v1322_v40, %v530_v13  ;;  %v752_v16 = vmul.f32 %v1322_v40, %v724_v14  ;;  %v154_v17 = vpop.f32.mrf.mxu0  ;;  %v338_v18 = vpop.f32.mrf.mxu1  ;;  %v799_v19 = vmax.f32 %v605_v12, %v783_v9 }
  0xd3   :  { %v184_v20 = vmul.f32 %v1322_v40, %v154_v17  ;;  %v365_v21 = vmul.f32 %v1322_v40, %v338_v18 }
  0xd4   :  { %v574_v22 = vadd.f32 %v1327_v41, %v558_v15  ;;  %815 = vxpose.xlu0.b32.end [8/8] (short) (narrow) %v799_v19, 64  ;;  %v768_v24 = vadd.f32 %v1327_v41, %v752_v16 }
  0xd5   :  { %v203_v25 = vadd.f32 %v1327_v41, %v184_v20  ;;  %v381_v27 = vadd.f32 %v1327_v41, %v365_v21 }
  0xd6   :  { %v590_v26 = vmax.f32 %v574_v22, 0.0  ;;  %v784_v28 = vmax.f32 %v768_v24, 0.0 }
  0xd7   :  { %v219_v30 = vmax.f32 %v203_v25, 0.0  ;;  %v397_v33 = vmax.f32 %v381_v27, 0.0 }
  0xd8   :  { %v606_v29 = vmax.f32 %v412_v23, %v590_v26 }
  0xd9   :  { %v532_v31 = vpop.f32.mrf.mxu2  ;;  %v726_v32 = vpop.f32.mrf.mxu3  ;;  %v413_v47 = vmax.f32 %v219_v30, %v397_v33 }
  0xda   :  { %v559_v34 = vmul.f32 %v1322_v40, %v532_v31  ;;  %v753_v35 = vmul.f32 %v1322_v40, %v726_v32  ;;  %v157_v36 = vpop.f32.mrf.mxu0  ;;  %v341_v37 = vpop.f32.mrf.mxu1  ;;  %v800_v38 = vmax.f32 %v606_v29, %v784_v28 }
  0xdb   :  { %v185_v39 = vmul.f32 %v1322_v40, %v157_v36  ;;  %v366_v42 = vmul.f32 %v1322_v40, %v341_v37 }
  0xdc   :  { %v575_v43 = vadd.f32 %v1327_v41, %v559_v34  ;;  %v769_v44 = vadd.f32 %v1327_v41, %v753_v35  ;;  %849 = vxpose.xlu1.b32.start [1/8] (short) (narrow) %v800_v38, 64 }
  0xdd   :  { %v204_v45 = vadd.f32 %v1327_v41, %v185_v39  ;;  %v382_v46 = vadd.f32 %v1327_v41, %v366_v42 }
  0xde   :  { %v591_v48 = vmax.f32 %v575_v43, 0.0  ;;  %v785_v49 = vmax.f32 %v769_v44, 0.0 }
  0xdf   :  { %v220_v50 = vmax.f32 %v204_v45, 0.0  ;;  %v398_v51 = vmax.f32 %v382_v46, 0.0 }
  0xe0   :  { %v607_v52 = vmax.f32 %v413_v47, %v591_v48 }
  0xe1   :  { %v535_v53 = vpop.f32.mrf.mxu2  ;;  %v729_v54 = vpop.f32.mrf.mxu3  ;;  %v414_v62 = vmax.f32 %v220_v50, %v398_v51 }
  0xe2   :  { %v560_v55 = vmul.f32 %v1322_v40, %v535_v53  ;;  %v754_v56 = vmul.f32 %v1322_v40, %v729_v54  ;;  %v159_v57 = vpop.f32.mrf.mxu0  ;;  %v343_v58 = vpop.f32.mrf.mxu1  ;;  %v801_v59 = vmax.f32 %v607_v52, %v785_v49 }
  0xe3   :  { %v186_v60 = vmul.f32 %v1322_v40, %v159_v57  ;;  %v367_v61 = vmul.f32 %v1322_v40, %v343_v58 }
  0xe4   :  { %v576_v63 = vadd.f32 %v1327_v41, %v560_v55  ;;  %v770_v0 = vadd.f32 %v1327_v41, %v754_v56  ;;  %850 = vxpose.xlu1.b32.cont [2/8] (short) (narrow) %v801_v59, 64 }
  0xe5   :  { %v205_v1 = vadd.f32 %v1327_v41, %v186_v60  ;;  %v383_v4 = vadd.f32 %v1327_v41, %v367_v61 }
  0xe6   :  { %v592_v2 = vmax.f32 %v576_v63, 0.0  ;;  %v786_v3 = vmax.f32 %v770_v0, 0.0 }
  0xe7   :  { %v221_v6 = vmax.f32 %v205_v1, 0.0  ;;  %v399_v9 = vmax.f32 %v383_v4, 0.0 }
  0xe8   :  { %v608_v5 = vmax.f32 %v414_v62, %v592_v2 }
  0xe9   :  { %v537_v7 = vpop.f32.mrf.mxu2  ;;  %v731_v8 = vpop.f32.mrf.mxu3  ;;  %v415_v21 = vmax.f32 %v221_v6, %v399_v9 }
  0xea   :  { %v561_v10 = vmul.f32 %v1322_v40, %v537_v7  ;;  %v755_v11 = vmul.f32 %v1322_v40, %v731_v8  ;;  %v162_v12 = vpop.f32.mrf.mxu0  ;;  %v346_v13 = vpop.f32.mrf.mxu1  ;;  %v802_v14 = vmax.f32 %v608_v5, %v786_v3 }
  0xeb   :  { %v187_v15 = vmul.f32 %v1322_v40, %v162_v12  ;;  %v368_v16 = vmul.f32 %v1322_v40, %v346_v13 }
  0xec   :  { %v577_v17 = vadd.f32 %v1327_v41, %v561_v10  ;;  %v771_v18 = vadd.f32 %v1327_v41, %v755_v11  ;;  %851 = vxpose.xlu1.b32.cont [3/8] (short) (narrow) %v802_v14, 64 }
  0xed   :  { %v206_v19 = vadd.f32 %v1327_v41, %v187_v15  ;;  %v384_v20 = vadd.f32 %v1327_v41, %v368_v16 }
  0xee   :  { %v593_v22 = vmax.f32 %v577_v17, 0.0  ;;  %v787_v23 = vmax.f32 %v771_v18, 0.0 }
  0xef   :  { %v222_v24 = vmax.f32 %v206_v19, 0.0  ;;  %v400_v25 = vmax.f32 %v384_v20, 0.0 }
  0xf0   :  { %v609_v26 = vmax.f32 %v415_v21, %v593_v22 }
  0xf1   :  { %v540_v27 = vpop.f32.mrf.mxu2  ;;  %v734_v28 = vpop.f32.mrf.mxu3  ;;  %v416_v36 = vmax.f32 %v222_v24, %v400_v25 }
  0xf2   :  { %v562_v29 = vmul.f32 %v1322_v40, %v540_v27  ;;  %v756_v30 = vmul.f32 %v1322_v40, %v734_v28  ;;  %v164_v31 = vpop.f32.mrf.mxu0  ;;  %v348_v32 = vpop.f32.mrf.mxu1  ;;  %v803_v33 = vmax.f32 %v609_v26, %v787_v23 }
  0xf3   :  { %v188_v34 = vmul.f32 %v1322_v40, %v164_v31  ;;  %v369_v35 = vmul.f32 %v1322_v40, %v348_v32 }
  0xf4   :  { %v578_v37 = vadd.f32 %v1327_v41, %v562_v29  ;;  %v772_v38 = vadd.f32 %v1327_v41, %v756_v30  ;;  %852 = vxpose.xlu1.b32.cont [4/8] (short) (narrow) %v803_v33, 64 }
  0xf5   :  { %v207_v39 = vadd.f32 %v1327_v41, %v188_v34  ;;  %v385_v44 = vadd.f32 %v1327_v41, %v369_v35 }
  0xf6   :  { %v594_v42 = vmax.f32 %v578_v37, 0.0  ;;  %v788_v43 = vmax.f32 %v772_v38, 0.0 }
  0xf7   :  { %v223_v46 = vmax.f32 %v207_v39, 0.0  ;;  %v401_v49 = vmax.f32 %v385_v44, 0.0 }
  0xf8   :  { %v610_v45 = vmax.f32 %v416_v36, %v594_v42 }
  0xf9   :  { %v542_v47 = vpop.f32.mrf.mxu2  ;;  %v736_v48 = vpop.f32.mrf.mxu3  ;;  %v417_v61 = vmax.f32 %v223_v46, %v401_v49 }
  0xfa   :  { %v563_v50 = vmul.f32 %v1322_v40, %v542_v47  ;;  %v757_v51 = vmul.f32 %v1322_v40, %v736_v48  ;;  %v167_v52 = vpop.f32.mrf.mxu0  ;;  %v351_v53 = vpop.f32.mrf.mxu1  ;;  %v804_v54 = vmax.f32 %v610_v45, %v788_v43 }
  0xfb   :  { %v189_v55 = vmul.f32 %v1322_v40, %v167_v52  ;;  %v370_v56 = vmul.f32 %v1322_v40, %v351_v53 }
  0xfc   :  { %v579_v57 = vadd.f32 %v1327_v41, %v563_v50  ;;  %v773_v58 = vadd.f32 %v1327_v41, %v757_v51  ;;  %853 = vxpose.xlu1.b32.cont [5/8] (short) (narrow) %v804_v54, 64 }
  0xfd   :  { %v208_v59 = vadd.f32 %v1327_v41, %v189_v55  ;;  %v386_v60 = vadd.f32 %v1327_v41, %v370_v56 }
  0xfe   :  { %v595_v62 = vmax.f32 %v579_v57, 0.0  ;;  %v789_v63 = vmax.f32 %v773_v58, 0.0 }
  0xff   :  { %v224_v0 = vmax.f32 %v208_v59, 0.0  ;;  %v402_v1 = vmax.f32 %v386_v60, 0.0 }
 0x100   :  { %v611_v2 = vmax.f32 %v417_v61, %v595_v62 }
 0x101   :  { %v545_v3 = vpop.f32.mrf.mxu2  ;;  %v739_v4 = vpop.f32.mrf.mxu3  ;;  %v418_v12 = vmax.f32 %v224_v0, %v402_v1 }
 0x102   :  { %v564_v5 = vmul.f32 %v1322_v40, %v545_v3  ;;  %v758_v6 = vmul.f32 %v1322_v40, %v739_v4  ;;  %v169_v7 = vpop.f32.mrf.mxu0  ;;  %v353_v8 = vpop.f32.mrf.mxu1  ;;  %v805_v9 = vmax.f32 %v611_v2, %v789_v63 }
 0x103   :  { %v190_v10 = vmul.f32 %v1322_v40, %v169_v7  ;;  %v371_v11 = vmul.f32 %v1322_v40, %v353_v8 }
 0x104   :  { %v580_v13 = vadd.f32 %v1327_v41, %v564_v5  ;;  %v774_v14 = vadd.f32 %v1327_v41, %v758_v6  ;;  %854 = vxpose.xlu1.b32.cont [6/8] (short) (narrow) %v805_v9, 64 }
 0x105   :  { %v209_v15 = vadd.f32 %v1327_v41, %v190_v10  ;;  %v387_v18 = vadd.f32 %v1327_v41, %v371_v11 }
 0x106   :  { %v596_v16 = vmax.f32 %v580_v13, 0.0  ;;  %v790_v17 = vmax.f32 %v774_v14, 0.0 }
 0x107   :  { %v225_v20 = vmax.f32 %v209_v15, 0.0  ;;  %v403_v23 = vmax.f32 %v387_v18, 0.0 }
 0x108   :  { %v612_v19 = vmax.f32 %v418_v12, %v596_v16 }
 0x109   :  { %v547_v21 = vpop.f32.mrf.mxu2  ;;  %v741_v22 = vpop.f32.mrf.mxu3  ;;  %v419_v29 = vmax.f32 %v225_v20, %v403_v23 }
 0x10a   :  { %v565_v24 = vmul.f32 %v1322_v40, %v547_v21  ;;  %v759_v25 = vmul.f32 %v1322_v40, %v741_v22  ;;  %v806_v26 = vmax.f32 %v612_v19, %v790_v17 }
 0x10c   :  { %v581_v27 = vadd.f32 %v1327_v41, %v565_v24  ;;  %v775_v28 = vadd.f32 %v1327_v41, %v759_v25  ;;  %855 = vxpose.xlu1.b32.cont [7/8] (short) (narrow) %v806_v26, 64 }
 0x10e   :  { %v597_v30 = vmax.f32 %v581_v27, 0.0  ;;  %v791_v31 = vmax.f32 %v775_v28, 0.0 }
 0x110   :  { %v613_v32 = vmax.f32 %v419_v29, %v597_v30 }
 0x112   :  { %v807_v33 = vmax.f32 %v613_v32, %v791_v31 }
 0x114   :  { %856 = vxpose.xlu1.b32.end [8/8] (short) (narrow) %v807_v33, 64 }
 0x140   :  { %v824_v34 = vpop.trf.xlu0 }
 0x141   :  { %841 = vst.msk [vmem:[%s1525_s4] sm:$0xff] %vm840_vm3, %v824_v34 }
 0x148   :  { %v825_v40 = vpop.trf.xlu0 }
 0x149   :  { %842 = vst.msk [vmem:[%s1525_s4 + $0x8] sm:$0xff] %vm840_vm3, %v825_v40 }
 0x150   :  { %v826_v41 = vpop.trf.xlu0 }
 0x151   :  { %843 = vst.msk [vmem:[%s1525_s4 + $0x10] sm:$0xff] %vm840_vm3, %v826_v41 }
 0x158   :  { %v827_v35 = vpop.trf.xlu0 }
 0x159   :  { %844 = vst.msk [vmem:[%s1525_s4 + $0x18] sm:$0xff] %vm840_vm3, %v827_v35 }
 0x160   :  { %v828_v36 = vpop.trf.xlu0 }
 0x161   :  { %845 = vst.msk [vmem:[%s1525_s4 + $0x20] sm:$0xff] %vm840_vm3, %v828_v36 }
 0x168   :  { %v829_v38 = vpop.trf.xlu0 }
 0x169   :  { %846 = vst.msk [vmem:[%s1525_s4 + $0x28] sm:$0xff] %vm840_vm3, %v829_v38 }
 0x170   :  { %v830_v42 = vpop.trf.xlu0 }
 0x171   :  { %847 = vst.msk [vmem:[%s1525_s4 + $0x30] sm:$0xff] %vm840_vm3, %v830_v42 }
 0x178   :  { %v831_v44 = vpop.trf.xlu0 }
 0x179   :  { %848 = vst.msk [vmem:[%s1525_s4 + $0x38] sm:$0xff] %vm840_vm3, %v831_v44 }
 0x180   :  { %v865_v37 = vpop.trf.xlu1 }
 0x181   :  { %1110 = vst.msk [vmem:[%s1525_s4 + $0x40] sm:$0xff] %vm840_vm3, %v865_v37 }
 0x188   :  { %v866_v39 = vpop.trf.xlu1 }
 0x189   :  { %1111 = vst.msk [vmem:[%s1525_s4 + $0x48] sm:$0xff] %vm840_vm3, %v866_v39 }
 0x190   :  { %v867_v43 = vpop.trf.xlu1 }
 0x191   :  { %1112 = vst.msk [vmem:[%s1525_s4 + $0x50] sm:$0xff] %vm840_vm3, %v867_v43 }
 0x198   :  { %v868_v45 = vpop.trf.xlu1 }
 0x199   :  { %1113 = vst.msk [vmem:[%s1525_s4 + $0x58] sm:$0xff] %vm840_vm3, %v868_v45 }
 0x1a0   :  { %v869_v46 = vpop.trf.xlu1 }
 0x1a1   :  { %1114 = vst.msk [vmem:[%s1525_s4 + $0x60] sm:$0xff] %vm840_vm3, %v869_v46 }
 0x1a8   :  { %v870_v47 = vpop.trf.xlu1 }
 0x1a9   :  { %1115 = vst.msk [vmem:[%s1525_s4 + $0x68] sm:$0xff] %vm840_vm3, %v870_v47 }
 0x1b0   :  { %v871_v48 = vpop.trf.xlu1 }
 0x1b1   :  { %1116 = vst.msk [vmem:[%s1525_s4 + $0x70] sm:$0xff] %vm840_vm3, %v871_v48 }
 0x1b8   :  { %v872_v49 = vpop.trf.xlu1 }
 0x1b9   :  { %1117 = vst.msk [vmem:[%s1525_s4 + $0x78] sm:$0xff] %vm840_vm3, %v872_v49 }

</bundles_post_ra>
